<compile_context>
chip_gen: v5e
topology: v5e:2x2
jax: 0.10.0
libtpu: 0.0.40
codegen_flags: <defaults>
</compile_context>

<pallas_src>
import functools

import jax
import jax.numpy as jnp
import numpy as np
from jax.experimental import pallas as pl
from jax.experimental.pallas import tpu as pltpu

EPS = 1e-5


def decoder_block_kernel(x_ref, mc_ref, md_ref,
                         w1_ref, g1_ref, be1_ref,
                         w2_ref, g2_ref, be2_ref,
                         w3_ref, g3_ref, be3_ref,
                         out_ref, *, W):
    M, _ = x_ref.shape
    Cmid = w1_ref.shape[1]
    Cout = w3_ref.shape[1] // 4
    inv_m = 1.0 / M
    inv_4m = 1.0 / (4.0 * M)

    def bn_affine(s, ss, inv_n, g, be):
        # single-pass batch stats: var = E[x^2] - mu^2 ; fold mean into the shift
        mu = s * inv_n
        var = ss * inv_n - mu * mu
        scale = jax.lax.rsqrt(var + EPS) * g
        return scale, be - mu * scale

    def rep4(r):   # per-channel row (1, c) -> (1, 4c) matching parity-major columns
        return jnp.concatenate([r, r, r, r], axis=1)

    def group_sum(v, c):   # sum the 4 parity column-groups -> per-channel row (1, c)
        return v[:, 0:c] + v[:, c:2 * c] + v[:, 2 * c:3 * c] + v[:, 3 * c:4 * c]

    # ---- stage 1: 1x1 conv + BN + ReLU (conv bias omitted: cancels in batch BN) ----
    h = jnp.dot(x_ref[...], w1_ref[...], preferred_element_type=jnp.float32)
    sc1, sh1 = bn_affine(jnp.sum(h, axis=0, keepdims=True),
                         jnp.sum(h * h, axis=0, keepdims=True),
                         inv_m, g1_ref[...], be1_ref[...])
    y1 = jnp.maximum(h * sc1 + sh1, 0.0)                         # (M, Cmid)

    # ---- stage 2: ConvTranspose2d(3,3,s=2,p=1,op=1) as ONE block matmul -----------
    # Output parity (2i+r, 2j+s) reads taps X[i,j], X[i,j+1], X[i+1,j], X[i+1,j+1].
    # Build the shifted taps as row shifts of the 2-D slab, mask image boundaries,
    # concatenate along channels, and multiply by the pre-assembled (4C, 4C) block
    # weight whose 4 column groups are the 4 output parities (o00|o01|o10|o11).
    mc = mc_ref[...]                                             # (M,1): j != W-1
    md = md_ref[...]                                             # (M,1): i != H-1
    ypad = jnp.concatenate([y1, jnp.zeros((W + 1, Cmid), jnp.float32)], axis=0)
    xcat = jnp.concatenate(
        [y1,                                                     # X[i,   j  ]
         ypad[1:M + 1, :] * mc,                                  # X[i,   j+1]
         ypad[W:M + W, :] * md,                                  # X[i+1, j  ]
         ypad[W + 1:M + W + 1, :] * (mc * md)],                  # X[i+1, j+1]
        axis=1)                                                  # (M, 4*Cmid)

    o = jnp.dot(xcat, w2_ref[...], preferred_element_type=jnp.float32)  # (M, 4*Cmid)

    sc2, sh2 = bn_affine(group_sum(jnp.sum(o, axis=0, keepdims=True), Cmid),
                         group_sum(jnp.sum(o * o, axis=0, keepdims=True), Cmid),
                         inv_4m, g2_ref[...], be2_ref[...])
    y2 = jnp.maximum(o * rep4(sc2) + rep4(sh2), 0.0)             # (M, 4*Cmid)

    # ---- stage 3: 1x1 conv as ONE block-diagonal matmul + BN + ReLU ----------------
    z = jnp.dot(y2, w3_ref[...], preferred_element_type=jnp.float32)    # (M, 4*Cout)
    sc3, sh3 = bn_affine(group_sum(jnp.sum(z, axis=0, keepdims=True), Cout),
                         group_sum(jnp.sum(z * z, axis=0, keepdims=True), Cout),
                         inv_4m, g3_ref[...], be3_ref[...])
    out_ref[...] = jnp.maximum(z * rep4(sc3) + rep4(sh3), 0.0)


@jax.jit
def decoder_block(x_nhwc, w1, g1, be1, w2blk, g2, be2, w3blk, g3, be3):
    N, H, W, Cin = x_nhwc.shape
    Cmid = w1.shape[1]
    Cout = w3blk.shape[1] // 4
    M = N * H * W

    x2d = x_nhwc.reshape(M, Cin)
    # boundary-validity masks for the shifted deconv taps (constant-folded by XLA)
    pos = jnp.arange(M, dtype=jnp.int32) % (H * W)
    mc = ((pos % W) != (W - 1)).astype(jnp.float32).reshape(M, 1)   # col j+1 valid
    md = ((pos // W) != (H - 1)).astype(jnp.float32).reshape(M, 1)  # row i+1 valid

    flops = 2 * M * (Cin * Cmid + (4 * Cmid) * (4 * Cmid) + (4 * Cmid) * (4 * Cout))
    bytes_accessed = 4 * (M * Cin + M * 4 * Cout + Cin * Cmid
                          + 16 * Cmid * Cmid + 16 * Cmid * Cout + 2 * M)

    vmem = pl.BlockSpec(memory_space=pltpu.MemorySpace.VMEM)
    out2d = pl.pallas_call(
        functools.partial(decoder_block_kernel, W=W),
        out_shape=jax.ShapeDtypeStruct((M, 4 * Cout), jnp.float32),
        in_specs=[vmem] * 12,
        out_specs=vmem,
        # 32 MiB scoped VMEM: >= default on v5e/v6e/v7x, well below physical everywhere;
        # the test problem needs only a few hundred KiB.
        compiler_params=pltpu.CompilerParams(vmem_limit_bytes=32 * 1024 * 1024),
        cost_estimate=pl.CostEstimate(flops=flops,
                                      transcendentals=2 * Cmid + Cout,
                                      bytes_accessed=bytes_accessed),
    )(x2d, mc, md, w1, g1, be1, w2blk, g2, be2, w3blk, g3, be3)
    # TODO(synk): for production-sized inputs on v7x (64 MiB VMEM) add a spatial grid
    # with BlockSpecs and two-pass / accumulated BN statistics instead of this
    # single-residency kernel; the test shapes fit comfortably in VMEM.

    # interleave the 4 parity column-groups into the (N, 2H, 2W, Cout) output
    out = out2d.reshape(N, H, W, 2, 2, Cout)
    out = out.transpose(0, 1, 3, 2, 4, 5).reshape(N, 2 * H, 2 * W, Cout)
    return out


def prepare_params(p):
    """Convert PyTorch-layout parameters into the fused kernel layout."""
    Cmid = p['w1'].shape[0]
    Cout = p['w3'].shape[0]

    w1k = np.ascontiguousarray(p['w1'][:, :, 0, 0].T)                  # (Cin, Cmid)
    w2k = np.transpose(p['w2'], (2, 3, 0, 1))                          # (3,3,Ci,Co)
    Z = np.zeros((Cmid, Cmid), np.float32)
    # rows: [X(i,j) | X(i,j+1) | X(i+1,j) | X(i+1,j+1)]; cols: [o00 | o01 | o10 | o11]
    w2blk = np.block([
        [w2k[1, 1], w2k[1, 2], w2k[2, 1], w2k[2, 2]],
        [Z,         w2k[1, 0], Z,         w2k[2, 0]],
        [Z,         Z,         w2k[0, 1], w2k[0, 2]],
        [Z,         Z,         Z,         w2k[0, 0]],
    ]).astype(np.float32)
    w3k = p['w3'][:, :, 0, 0].T                                        # (Cmid, Cout)
    w3blk = np.zeros((4 * Cmid, 4 * Cout), np.float32)
    for g in range(4):
        w3blk[g * Cmid:(g + 1) * Cmid, g * Cout:(g + 1) * Cout] = w3k

    row = lambda v: jnp.asarray(np.asarray(v, np.float32)[None, :])
    # NOTE: conv biases b1/b2/b3 are intentionally dropped — they cancel exactly
    # inside training-mode BatchNorm (the batch mean absorbs them).
    return (jnp.asarray(w1k), row(p['g1']), row(p['be1']),
            jnp.asarray(w2blk), row(p['g2']), row(p['be2']),
            jnp.asarray(w3blk), row(p['g3']), row(p['be3']))


# ------------------------ pure-numpy PyTorch-semantics reference --------------
def torch_reference(x_nchw, p):
    def bn_relu(y, g, b):
        mu = y.mean(axis=(0, 2, 3), keepdims=True)
        var = ((y - mu) ** 2).mean(axis=(0, 2, 3), keepdims=True)
        y = (y - mu) / np.sqrt(var + EPS) * g[None, :, None, None] + b[None, :, None, None]
        return np.maximum(y, 0.0)

    # conv1 (1x1)
    y = np.einsum('nchw,oc->nohw', x_nchw, p['w1'][:, :, 0, 0]) + p['b1'][None, :, None, None]
    y = bn_relu(y, p['g1'], p['be1'])

    # deconv2: ConvTranspose2d(k=3, stride=2, pad=1, output_pad=1)  (scatter form)
    N, C, H, W = y.shape
    Ho, Wo = 2 * H, 2 * W
    out = np.zeros((N, p['w2'].shape[1], Ho, Wo), dtype=np.float64)
    for ky in range(3):
        for kx in range(3):
            contrib = np.einsum('nchw,co->nohw', y, p['w2'][:, :, ky, kx])
            for iy in range(H):
                oy = 2 * iy - 1 + ky
                if not (0 <= oy < Ho):
                    continue
                for ix in range(W):
                    ox = 2 * ix - 1 + kx
                    if not (0 <= ox < Wo):
                        continue
                    out[:, :, oy, ox] += contrib[:, :, iy, ix]
    out = out + p['b2'][None, :, None, None]
    out = bn_relu(out, p['g2'], p['be2'])

    # conv3 (1x1)
    z = np.einsum('nchw,oc->nohw', out, p['w3'][:, :, 0, 0]) + p['b3'][None, :, None, None]
    z = bn_relu(z, p['g3'], p['be3'])
    return z


if __name__ == "__main__":
    N, Cin, H, W = 2, 16, 8, 8      # x: (N, Cin, H, W) in PyTorch NCHW terms
    n_filters = 8
    Cmid = Cin // 4

    key = jax.random.PRNGKey(0)
    ks = jax.random.split(key, 16)

    def rnd(k, shape, scale=0.2):
        return np.asarray(jax.random.normal(k, shape, dtype=jnp.float32)) * scale

    # PyTorch-shaped parameters (deterministic synthetic init)
    p = {
        'w1': rnd(ks[0], (Cmid, Cin, 1, 1)),            # Conv2d(Cin, Cmid, 1)
        'b1': rnd(ks[1], (Cmid,)),
        'g1': 1.0 + rnd(ks[2], (Cmid,), 0.1),
        'be1': rnd(ks[3], (Cmid,), 0.1),
        'w2': rnd(ks[4], (Cmid, Cmid, 3, 3)),           # ConvTranspose2d(Cmid, Cmid, 3)
        'b2': rnd(ks[5], (Cmid,)),
        'g2': 1.0 + rnd(ks[6], (Cmid,), 0.1),
        'be2': rnd(ks[7], (Cmid,), 0.1),
        'w3': rnd(ks[8], (n_filters, Cmid, 1, 1)),      # Conv2d(Cmid, n_filters, 1)
        'b3': rnd(ks[9], (n_filters,)),
        'g3': 1.0 + rnd(ks[10], (n_filters,), 0.1),
        'be3': rnd(ks[11], (n_filters,), 0.1),
    }

    x_nchw = np.asarray(jax.random.normal(ks[12], (N, Cin, H, W), dtype=jnp.float32))
    x_nhwc = jnp.asarray(np.transpose(x_nchw, (0, 2, 3, 1)))

    params = prepare_params(p)
    out_nhwc = decoder_block(x_nhwc, *params)
    out_nhwc = np.asarray(jax.block_until_ready(out_nhwc))

    # reference in float64 (includes the conv biases — they cancel in batch BN)
    ref_nchw = torch_reference(x_nchw.astype(np.float64),
                               {k: v.astype(np.float64) for k, v in p.items()})
    ref_nhwc = np.transpose(ref_nchw, (0, 2, 3, 1))

    # Default-precision (single-pass bf16) MXU matmuls vs the float64 reference:
    # tight on aggregate error, looser on per-element tails.  Real logic errors
    # (wrong parity / mask / BN stats) are O(0.5 - 1) and would still fail.
    rel_rms = (np.sqrt(np.mean((out_nhwc - ref_nhwc) ** 2))
               / (np.sqrt(np.mean(ref_nhwc ** 2)) + 1e-12))
    assert rel_rms < 2e-2, f"relative RMS error too large: {rel_rms}"
    np.testing.assert_allclose(out_nhwc, ref_nhwc, rtol=5e-2, atol=5e-2)

    print("KERNEL_OK")
</pallas_src>

<mosaic_0001>
module attributes {stable_mosaic.version = 11 : i64} {
  func.func @decoder_block_kernel(%arg0: memref<128x16xf32, #tpu.memory_space<vmem>>, %arg1: memref<128x1xf32, #tpu.memory_space<vmem>>, %arg2: memref<128x1xf32, #tpu.memory_space<vmem>>, %arg3: memref<16x4xf32, #tpu.memory_space<vmem>>, %arg4: memref<1x4xf32, #tpu.memory_space<vmem>>, %arg5: memref<1x4xf32, #tpu.memory_space<vmem>>, %arg6: memref<16x16xf32, #tpu.memory_space<vmem>>, %arg7: memref<1x4xf32, #tpu.memory_space<vmem>>, %arg8: memref<1x4xf32, #tpu.memory_space<vmem>>, %arg9: memref<16x32xf32, #tpu.memory_space<vmem>>, %arg10: memref<1x8xf32, #tpu.memory_space<vmem>>, %arg11: memref<1x8xf32, #tpu.memory_space<vmem>>, %arg12: memref<128x32xf32, #tpu.memory_space<vmem>>) attributes {dimension_semantics = [], scalar_prefetch = 0 : i64, scratch_operands = 0 : i64, tpu.core_type = #tpu.core_type<tc>} {
    %c0 = arith.constant 0 : index
    %c0_0 = arith.constant 0 : index
    %0 = vector.load %arg0[%c0, %c0_0] : memref<128x16xf32, #tpu.memory_space<vmem>>, vector<128x16xf32>
    %c0_1 = arith.constant 0 : index
    %c0_2 = arith.constant 0 : index
    %1 = vector.load %arg3[%c0_1, %c0_2] : memref<16x4xf32, #tpu.memory_space<vmem>>, vector<16x4xf32>
    %cst = arith.constant dense<0.000000e+00> : vector<128x4xf32>
    %2 = tpu.matmul %0, %1, %cst {dimension_numbers = #tpu.dot_dimension_numbers<[1], [0], [0], [1], [0, 0, 1, 1], [], []>} : vector<128x16xf32>, vector<16x4xf32>, vector<128x4xf32> -> vector<128x4xf32>
    %cst_3 = arith.constant dense<0.000000e+00> : vector<4xf32>
    %3 = vector.multi_reduction <add>, %2, %cst_3 [0] : vector<128x4xf32> to vector<4xf32>
    %4 = vector.shape_cast %3 : vector<4xf32> to vector<1x4xf32>
    %5 = arith.mulf %2, %2 : vector<128x4xf32>
    %cst_4 = arith.constant dense<0.000000e+00> : vector<4xf32>
    %6 = vector.multi_reduction <add>, %5, %cst_4 [0] : vector<128x4xf32> to vector<4xf32>
    %7 = vector.shape_cast %6 : vector<4xf32> to vector<1x4xf32>
    %c0_5 = arith.constant 0 : index
    %c0_6 = arith.constant 0 : index
    %8 = vector.load %arg4[%c0_5, %c0_6] : memref<1x4xf32, #tpu.memory_space<vmem>>, vector<1x4xf32>
    %c0_7 = arith.constant 0 : index
    %c0_8 = arith.constant 0 : index
    %9 = vector.load %arg5[%c0_7, %c0_8] : memref<1x4xf32, #tpu.memory_space<vmem>>, vector<1x4xf32>
    %cst_9 = arith.constant 7.812500e-03 : f32
    %10 = vector.broadcast %cst_9 : f32 to vector<1x4xf32>
    %11 = arith.mulf %4, %10 : vector<1x4xf32>
    %cst_10 = arith.constant 7.812500e-03 : f32
    %12 = vector.broadcast %cst_10 : f32 to vector<1x4xf32>
    %13 = arith.mulf %7, %12 : vector<1x4xf32>
    %14 = arith.mulf %11, %11 : vector<1x4xf32>
    %15 = arith.subf %13, %14 : vector<1x4xf32>
    %cst_11 = arith.constant 9.99999974E-6 : f32
    %16 = vector.broadcast %cst_11 : f32 to vector<1x4xf32>
    %17 = arith.addf %15, %16 : vector<1x4xf32>
    %18 = math.rsqrt %17 : vector<1x4xf32>
    %19 = arith.mulf %18, %8 : vector<1x4xf32>
    %20 = arith.mulf %11, %19 : vector<1x4xf32>
    %21 = arith.subf %9, %20 : vector<1x4xf32>
    %22 = vector.broadcast %19 : vector<1x4xf32> to vector<128x4xf32>
    %23 = arith.mulf %2, %22 : vector<128x4xf32>
    %24 = vector.broadcast %21 : vector<1x4xf32> to vector<128x4xf32>
    %25 = arith.addf %23, %24 : vector<128x4xf32>
    %cst_12 = arith.constant 0.000000e+00 : f32
    %26 = vector.broadcast %cst_12 : f32 to vector<128x4xf32>
    %27 = arith.maximumf %25, %26 : vector<128x4xf32>
    %c0_13 = arith.constant 0 : index
    %c0_14 = arith.constant 0 : index
    %28 = vector.load %arg1[%c0_13, %c0_14] : memref<128x1xf32, #tpu.memory_space<vmem>>, vector<128x1xf32>
    %c0_15 = arith.constant 0 : index
    %c0_16 = arith.constant 0 : index
    %29 = vector.load %arg2[%c0_15, %c0_16] : memref<128x1xf32, #tpu.memory_space<vmem>>, vector<128x1xf32>
    %cst_17 = arith.constant 0.000000e+00 : f32
    %30 = vector.broadcast %cst_17 : f32 to vector<9x4xf32>
    %31 = tpu.concatenate %27, %30 in 0 : vector<128x4xf32>, vector<9x4xf32> -> vector<137x4xf32>
    %32 = vector.extract_strided_slice %31 {offsets = [1, 0], sizes = [128, 4], strides = [1, 1]} : vector<137x4xf32> to vector<128x4xf32>
    %33 = vector.broadcast %28 : vector<128x1xf32> to vector<128x4xf32>
    %34 = arith.mulf %32, %33 : vector<128x4xf32>
    %35 = vector.extract_strided_slice %31 {offsets = [8, 0], sizes = [128, 4], strides = [1, 1]} : vector<137x4xf32> to vector<128x4xf32>
    %36 = vector.broadcast %29 : vector<128x1xf32> to vector<128x4xf32>
    %37 = arith.mulf %35, %36 : vector<128x4xf32>
    %38 = vector.extract_strided_slice %31 {offsets = [9, 0], sizes = [128, 4], strides = [1, 1]} : vector<137x4xf32> to vector<128x4xf32>
    %39 = arith.mulf %28, %29 : vector<128x1xf32>
    %40 = vector.broadcast %39 : vector<128x1xf32> to vector<128x4xf32>
    %41 = arith.mulf %38, %40 : vector<128x4xf32>
    %42 = tpu.concatenate %27, %34, %37, %41 in 1 : vector<128x4xf32>, vector<128x4xf32>, vector<128x4xf32>, vector<128x4xf32> -> vector<128x16xf32>
    %c0_18 = arith.constant 0 : index
    %c0_19 = arith.constant 0 : index
    %43 = vector.load %arg6[%c0_18, %c0_19] : memref<16x16xf32, #tpu.memory_space<vmem>>, vector<16x16xf32>
    %cst_20 = arith.constant dense<0.000000e+00> : vector<128x16xf32>
    %44 = tpu.matmul %42, %43, %cst_20 {dimension_numbers = #tpu.dot_dimension_numbers<[1], [0], [0], [1], [0, 0, 1, 1], [], []>} : vector<128x16xf32>, vector<16x16xf32>, vector<128x16xf32> -> vector<128x16xf32>
    %cst_21 = arith.constant dense<0.000000e+00> : vector<16xf32>
    %45 = vector.multi_reduction <add>, %44, %cst_21 [0] : vector<128x16xf32> to vector<16xf32>
    %46 = vector.shape_cast %45 : vector<16xf32> to vector<1x16xf32>
    %47 = vector.extract_strided_slice %46 {offsets = [0, 0], sizes = [1, 4], strides = [1, 1]} : vector<1x16xf32> to vector<1x4xf32>
    %48 = vector.extract_strided_slice %46 {offsets = [0, 4], sizes = [1, 4], strides = [1, 1]} : vector<1x16xf32> to vector<1x4xf32>
    %49 = arith.addf %47, %48 : vector<1x4xf32>
    %50 = vector.extract_strided_slice %46 {offsets = [0, 8], sizes = [1, 4], strides = [1, 1]} : vector<1x16xf32> to vector<1x4xf32>
    %51 = arith.addf %49, %50 : vector<1x4xf32>
    %52 = vector.extract_strided_slice %46 {offsets = [0, 12], sizes = [1, 4], strides = [1, 1]} : vector<1x16xf32> to vector<1x4xf32>
    %53 = arith.addf %51, %52 : vector<1x4xf32>
    %54 = arith.mulf %44, %44 : vector<128x16xf32>
    %cst_22 = arith.constant dense<0.000000e+00> : vector<16xf32>
    %55 = vector.multi_reduction <add>, %54, %cst_22 [0] : vector<128x16xf32> to vector<16xf32>
    %56 = vector.shape_cast %55 : vector<16xf32> to vector<1x16xf32>
    %57 = vector.extract_strided_slice %56 {offsets = [0, 0], sizes = [1, 4], strides = [1, 1]} : vector<1x16xf32> to vector<1x4xf32>
    %58 = vector.extract_strided_slice %56 {offsets = [0, 4], sizes = [1, 4], strides = [1, 1]} : vector<1x16xf32> to vector<1x4xf32>
    %59 = arith.addf %57, %58 : vector<1x4xf32>
    %60 = vector.extract_strided_slice %56 {offsets = [0, 8], sizes = [1, 4], strides = [1, 1]} : vector<1x16xf32> to vector<1x4xf32>
    %61 = arith.addf %59, %60 : vector<1x4xf32>
    %62 = vector.extract_strided_slice %56 {offsets = [0, 12], sizes = [1, 4], strides = [1, 1]} : vector<1x16xf32> to vector<1x4xf32>
    %63 = arith.addf %61, %62 : vector<1x4xf32>
    %c0_23 = arith.constant 0 : index
    %c0_24 = arith.constant 0 : index
    %64 = vector.load %arg7[%c0_23, %c0_24] : memref<1x4xf32, #tpu.memory_space<vmem>>, vector<1x4xf32>
    %c0_25 = arith.constant 0 : index
    %c0_26 = arith.constant 0 : index
    %65 = vector.load %arg8[%c0_25, %c0_26] : memref<1x4xf32, #tpu.memory_space<vmem>>, vector<1x4xf32>
    %cst_27 = arith.constant 0.001953125 : f32
    %66 = vector.broadcast %cst_27 : f32 to vector<1x4xf32>
    %67 = arith.mulf %53, %66 : vector<1x4xf32>
    %cst_28 = arith.constant 0.001953125 : f32
    %68 = vector.broadcast %cst_28 : f32 to vector<1x4xf32>
    %69 = arith.mulf %63, %68 : vector<1x4xf32>
    %70 = arith.mulf %67, %67 : vector<1x4xf32>
    %71 = arith.subf %69, %70 : vector<1x4xf32>
    %cst_29 = arith.constant 9.99999974E-6 : f32
    %72 = vector.broadcast %cst_29 : f32 to vector<1x4xf32>
    %73 = arith.addf %71, %72 : vector<1x4xf32>
    %74 = math.rsqrt %73 : vector<1x4xf32>
    %75 = arith.mulf %74, %64 : vector<1x4xf32>
    %76 = arith.mulf %67, %75 : vector<1x4xf32>
    %77 = arith.subf %65, %76 : vector<1x4xf32>
    %78 = tpu.concatenate %75, %75, %75, %75 in 1 : vector<1x4xf32>, vector<1x4xf32>, vector<1x4xf32>, vector<1x4xf32> -> vector<1x16xf32>
    %79 = vector.broadcast %78 : vector<1x16xf32> to vector<128x16xf32>
    %80 = arith.mulf %44, %79 : vector<128x16xf32>
    %81 = tpu.concatenate %77, %77, %77, %77 in 1 : vector<1x4xf32>, vector<1x4xf32>, vector<1x4xf32>, vector<1x4xf32> -> vector<1x16xf32>
    %82 = vector.broadcast %81 : vector<1x16xf32> to vector<128x16xf32>
    %83 = arith.addf %80, %82 : vector<128x16xf32>
    %cst_30 = arith.constant 0.000000e+00 : f32
    %84 = vector.broadcast %cst_30 : f32 to vector<128x16xf32>
    %85 = arith.maximumf %83, %84 : vector<128x16xf32>
    %c0_31 = arith.constant 0 : index
    %c0_32 = arith.constant 0 : index
    %86 = vector.load %arg9[%c0_31, %c0_32] : memref<16x32xf32, #tpu.memory_space<vmem>>, vector<16x32xf32>
    %cst_33 = arith.constant dense<0.000000e+00> : vector<128x32xf32>
    %87 = tpu.matmul %85, %86, %cst_33 {dimension_numbers = #tpu.dot_dimension_numbers<[1], [0], [0], [1], [0, 0, 1, 1], [], []>} : vector<128x16xf32>, vector<16x32xf32>, vector<128x32xf32> -> vector<128x32xf32>
    %cst_34 = arith.constant dense<0.000000e+00> : vector<32xf32>
    %88 = vector.multi_reduction <add>, %87, %cst_34 [0] : vector<128x32xf32> to vector<32xf32>
    %89 = vector.shape_cast %88 : vector<32xf32> to vector<1x32xf32>
    %90 = vector.extract_strided_slice %89 {offsets = [0, 0], sizes = [1, 8], strides = [1, 1]} : vector<1x32xf32> to vector<1x8xf32>
    %91 = vector.extract_strided_slice %89 {offsets = [0, 8], sizes = [1, 8], strides = [1, 1]} : vector<1x32xf32> to vector<1x8xf32>
    %92 = arith.addf %90, %91 : vector<1x8xf32>
    %93 = vector.extract_strided_slice %89 {offsets = [0, 16], sizes = [1, 8], strides = [1, 1]} : vector<1x32xf32> to vector<1x8xf32>
    %94 = arith.addf %92, %93 : vector<1x8xf32>
    %95 = vector.extract_strided_slice %89 {offsets = [0, 24], sizes = [1, 8], strides = [1, 1]} : vector<1x32xf32> to vector<1x8xf32>
    %96 = arith.addf %94, %95 : vector<1x8xf32>
    %97 = arith.mulf %87, %87 : vector<128x32xf32>
    %cst_35 = arith.constant dense<0.000000e+00> : vector<32xf32>
    %98 = vector.multi_reduction <add>, %97, %cst_35 [0] : vector<128x32xf32> to vector<32xf32>
    %99 = vector.shape_cast %98 : vector<32xf32> to vector<1x32xf32>
    %100 = vector.extract_strided_slice %99 {offsets = [0, 0], sizes = [1, 8], strides = [1, 1]} : vector<1x32xf32> to vector<1x8xf32>
    %101 = vector.extract_strided_slice %99 {offsets = [0, 8], sizes = [1, 8], strides = [1, 1]} : vector<1x32xf32> to vector<1x8xf32>
    %102 = arith.addf %100, %101 : vector<1x8xf32>
    %103 = vector.extract_strided_slice %99 {offsets = [0, 16], sizes = [1, 8], strides = [1, 1]} : vector<1x32xf32> to vector<1x8xf32>
    %104 = arith.addf %102, %103 : vector<1x8xf32>
    %105 = vector.extract_strided_slice %99 {offsets = [0, 24], sizes = [1, 8], strides = [1, 1]} : vector<1x32xf32> to vector<1x8xf32>
    %106 = arith.addf %104, %105 : vector<1x8xf32>
    %c0_36 = arith.constant 0 : index
    %c0_37 = arith.constant 0 : index
    %107 = vector.load %arg10[%c0_36, %c0_37] : memref<1x8xf32, #tpu.memory_space<vmem>>, vector<1x8xf32>
    %c0_38 = arith.constant 0 : index
    %c0_39 = arith.constant 0 : index
    %108 = vector.load %arg11[%c0_38, %c0_39] : memref<1x8xf32, #tpu.memory_space<vmem>>, vector<1x8xf32>
    %cst_40 = arith.constant 0.001953125 : f32
    %109 = vector.broadcast %cst_40 : f32 to vector<1x8xf32>
    %110 = arith.mulf %96, %109 : vector<1x8xf32>
    %cst_41 = arith.constant 0.001953125 : f32
    %111 = vector.broadcast %cst_41 : f32 to vector<1x8xf32>
    %112 = arith.mulf %106, %111 : vector<1x8xf32>
    %113 = arith.mulf %110, %110 : vector<1x8xf32>
    %114 = arith.subf %112, %113 : vector<1x8xf32>
    %cst_42 = arith.constant 9.99999974E-6 : f32
    %115 = vector.broadcast %cst_42 : f32 to vector<1x8xf32>
    %116 = arith.addf %114, %115 : vector<1x8xf32>
    %117 = math.rsqrt %116 : vector<1x8xf32>
    %118 = arith.mulf %117, %107 : vector<1x8xf32>
    %119 = arith.mulf %110, %118 : vector<1x8xf32>
    %120 = arith.subf %108, %119 : vector<1x8xf32>
    %121 = tpu.concatenate %118, %118, %118, %118 in 1 : vector<1x8xf32>, vector<1x8xf32>, vector<1x8xf32>, vector<1x8xf32> -> vector<1x32xf32>
    %122 = vector.broadcast %121 : vector<1x32xf32> to vector<128x32xf32>
    %123 = arith.mulf %87, %122 : vector<128x32xf32>
    %124 = tpu.concatenate %120, %120, %120, %120 in 1 : vector<1x8xf32>, vector<1x8xf32>, vector<1x8xf32>, vector<1x8xf32> -> vector<1x32xf32>
    %125 = vector.broadcast %124 : vector<1x32xf32> to vector<128x32xf32>
    %126 = arith.addf %123, %125 : vector<128x32xf32>
    %cst_43 = arith.constant 0.000000e+00 : f32
    %127 = vector.broadcast %cst_43 : f32 to vector<128x32xf32>
    %128 = arith.maximumf %126, %127 : vector<128x32xf32>
    %c0_44 = arith.constant 0 : index
    %c0_45 = arith.constant 0 : index
    %129 = vector.load %arg12[%c0_44, %c0_45] : memref<128x32xf32, #tpu.memory_space<vmem>>, vector<128x32xf32>
    tpu.vector_store %arg12[%c0_44, %c0_45], %128 {strides = array<i32>} : memref<128x32xf32, #tpu.memory_space<vmem>>, vector<128x32xf32>,
    return
  }
}

</mosaic_0001>

<bundles_post_ra>
// kernel: decoder_block.1
= control target key start
LH: loop header
LB: loop body
LE: loop exit
PB: predicated region body
PF: predicated region fallthrough
CT: control target
= control target key end

     0   :  { %v1802_v0 = vmov 0   ;;  %vm59_vm0 = vcmask 130048   ;;  %vm173_vm1 = vcmask 31744   ;;  %vm432_vm5 = vcmask 1040384   ;;  %s1805_s27 = smov 12   ;;  %s1807_s13 = smov 124   ;;  %s3071_s3 = inlined_call_operand.vmem [shape: f32[16,4], index: 3, kind: input, shape index: {}]   ;;  %s3072_s1 = inlined_call_operand.vmem [shape: f32[128,1], index: 1, kind: input, shape index: {}]   ;;  %s3073_s0 = inlined_call_operand.vmem [shape: f32[128,16], index: 0, kind: input, shape index: {}]   ;;  %s3074_s2 = inlined_call_operand.vmem [shape: f32[128,1], index: 2, kind: input, shape index: {}]   ;;  %s3075_s4 = inlined_call_operand.vmem [shape: f32[1,4], index: 4, kind: input, shape index: {}]   ;;  %s3076_s5 = inlined_call_operand.vmem [shape: f32[1,4], index: 5, kind: input, shape index: {}]   ;;  %s3077_s6 = inlined_call_operand.vmem [shape: f32[16,16], index: 6, kind: input, shape index: {}]   ;;  %s3078_s7 = inlined_call_operand.vmem [shape: f32[1,4], index: 7, kind: input, shape index: {}]   ;;  %s3079_s8 = inlined_call_operand.vmem [shape: f32[1,4], index: 8, kind: input, shape index: {}]   ;;  %s3080_s9 = inlined_call_operand.vmem [shape: f32[16,32], index: 9, kind: input, shape index: {}]   ;;  %s3081_s10 = inlined_call_operand.vmem [shape: f32[1,8], index: 10, kind: input, shape index: {}]   ;;  %s3082_s11 = inlined_call_operand.vmem [shape: f32[1,8], index: 11, kind: input, shape index: {}]   ;;  %s3083_s12 = inlined_call_operand.vmem [shape: f32[128,32], index: 12, kind: output, shape index: {}]  }
   0x1   :  { %1793 = vset.pattern.permute.xlu0 %v1802_v0  ;;  %v58_v1 = vld [vmem:[%s3071_s3 + $0x8] sm:$0xff]  ;;  %v336_v2 = vld [vmem:[%s3072_s1] sm:$0xff]  ;;  %1794 = vset.pattern.permute.xlu1 %v1802_v0  ;;  %v338_v11 = vld [vmem:[%s3072_s1 + $0x10] sm:$0xff]  ;;  %vm756_vm6 = vcmask 1046528   ;;  %vm1016_vm7 = vcmask 64512   ;;  %vm1033_vm8 = vcmask 97280  }
   0x2   :  { %v57_v3 = vld [vmem:[%s3071_s3] sm:$0xff]  ;;  %122 = vmatpush.msra.mxu0 %v58_v1  ;;  %370 = vperm.xlu0 %1793, %v336_v2   ;;  %v353_v7 = vld [vmem:[%s3074_s2 + $0x8] sm:$0xff]  ;;  %v354_v12 = vld [vmem:[%s3074_s2 + $0x10] sm:$0xff]  ;;  %s1808_s14 = smov 116   ;;  %vm1493_vm12 = vcmask 261120   ;;  %s1810_s20 = smov 104  }
   0x3   :  { %v41_v4 = vld [vmem:[%s3073_s0] sm:$0xff]  ;;  %1776 = vmatpush.msra.mxu3 %v58_v1  ;;  %1795 = vset.pattern.permute.xlu2 %v1802_v0  ;;  %v337_v8 = vld [vmem:[%s3072_s1 + $0x8] sm:$0xff]  ;;  %v596_v13 = vmul.f32 %v354_v12, %v338_v11  ;;  %v43_v14 = vld [vmem:[%s3073_s0 + $0x10] sm:$0xff] }
   0x4   :  { %v352_v5 = vld [vmem:[%s3074_s2] sm:$0xff]  ;;  %123 = vmatpush.msra.mxu0 %v57_v3  ;;  %v595_v9 = vmul.f32 %v353_v7, %v337_v8  ;;  %v42_v10 = vld [vmem:[%s3073_s0 + $0x8] sm:$0xff]  ;;  %v339_v15 = vld [vmem:[%s3072_s1 + $0x18] sm:$0xff] }
   0x5   :  { %v594_v6 = vmul.f32 %v352_v5, %v336_v2  ;;  %500 = vperm.xlu2 %1795, %v352_v5   ;;  %1728 = vmatmul.msk.f32.vlgmr.msra.gmra.mxu0 %vm59_vm0, %v41_v4  ;;  %v355_v16 = vld [vmem:[%s3074_s2 + $0x18] sm:$0xff]  ;;  %v340_v19 = vld [vmem:[%s3072_s1 + $0x20] sm:$0xff]  ;;  %v341_v23 = vld [vmem:[%s3072_s1 + $0x28] sm:$0xff] }
   0x6   :  { %1777 = vmatpush.msra.mxu3 %v57_v3  ;;  %v597_v17 = vmul.f32 %v355_v16, %v339_v15  ;;  %v44_v18 = vld [vmem:[%s3073_s0 + $0x18] sm:$0xff]  ;;  %v356_v20 = vld [vmem:[%s3074_s2 + $0x20] sm:$0xff]  ;;  %v357_v24 = vld [vmem:[%s3074_s2 + $0x28] sm:$0xff] }
   0x7   :  { %612 = vperm.xlu1 %1794, %v594_v6   ;;  %v598_v21 = vmul.f32 %v356_v20, %v340_v19  ;;  %v45_v22 = vld [vmem:[%s3073_s0 + $0x20] sm:$0xff]  ;;  %v599_v26 = vmul.f32 %v357_v24, %v341_v23  ;;  %v46_v27 = vld [vmem:[%s3073_s0 + $0x28] sm:$0xff]  ;;  %v342_v28 = vld [vmem:[%s3072_s1 + $0x30] sm:$0xff] }
   0x8   :  { %v53_v25 = vld [vmem:[%s3073_s0 + $0x60] sm:$0xff]  ;;  %v358_v29 = vld [vmem:[%s3074_s2 + $0x30] sm:$0xff]  ;;  %v54_v30 = vld [vmem:[%s3073_s0 + $0x68] sm:$0xff] }
   0x9   :  { %1740 = vmatmul.msk.f32.vlgmr.msra.gmra.mxu3 %vm59_vm0, %v53_v25  ;;  %v600_v31 = vmul.f32 %v358_v29, %v342_v28  ;;  %v47_v32 = vld [vmem:[%s3073_s0 + $0x30] sm:$0xff]  ;;  %v343_v34 = vld [vmem:[%s3072_s1 + $0x38] sm:$0xff]  ;;  %v49_v39 = vld [vmem:[%s3073_s0 + $0x40] sm:$0xff] }
   0xa   :  { %374 = vperm.xlu0 %1793, %v337_v8   ;;  %v55_v33 = vld [vmem:[%s3073_s0 + $0x70] sm:$0xff]  ;;  %v48_v35 = vld [vmem:[%s3073_s0 + $0x38] sm:$0xff]  ;;  %v344_v40 = vld [vmem:[%s3072_s1 + $0x40] sm:$0xff] }
   0xb   :  { %v359_v36 = vld [vmem:[%s3074_s2 + $0x38] sm:$0xff]  ;;  %v50_v41 = vld [vmem:[%s3073_s0 + $0x48] sm:$0xff]  ;;  %v348_v42 = vld [vmem:[%s3072_s1 + $0x60] sm:$0xff] }
   0xc   :  { %v56_v37 = vld [vmem:[%s3073_s0 + $0x78] sm:$0xff]  ;;  %v601_v38 = vmul.f32 %v359_v36, %v343_v34  ;;  %v360_v43 = vld [vmem:[%s3074_s2 + $0x40] sm:$0xff]  ;;  %v349_v44 = vld [vmem:[%s3072_s1 + $0x68] sm:$0xff] }
   0xd   :  { %378 = vperm.xlu2 %1795, %v338_v11   ;;  %1729 = vmatmul.msk.f32.gmra.mxu0 %vm59_vm0, %v42_v10  ;;  %v602_v45 = vmul.f32 %v360_v43, %v344_v40  ;;  %v347_v46 = vld [vmem:[%s3072_s1 + $0x58] sm:$0xff]  ;;  %v364_v48 = vld [vmem:[%s3074_s2 + $0x60] sm:$0xff]  ;;  %v51_v51 = vld [vmem:[%s3073_s0 + $0x50] sm:$0xff] }
   0xe   :  { %v363_v47 = vld [vmem:[%s3074_s2 + $0x58] sm:$0xff]  ;;  %v606_v50 = vmul.f32 %v364_v48, %v348_v42  ;;  %v345_v52 = vld [vmem:[%s3072_s1 + $0x48] sm:$0xff]  ;;  %v362_v54 = vld [vmem:[%s3074_s2 + $0x50] sm:$0xff] }
   0xf   :  { %616 = vperm.xlu1 %1794, %v595_v9   ;;  %v605_v49 = vmul.f32 %v363_v47, %v347_v46  ;;  %v52_v53 = vld [vmem:[%s3073_s0 + $0x58] sm:$0xff]  ;;  %v346_v55 = vld [vmem:[%s3072_s1 + $0x50] sm:$0xff]  ;;  %v361_v58 = vld [vmem:[%s3074_s2 + $0x48] sm:$0xff] }
  0x10   :  { %v350_v56 = vld [vmem:[%s3072_s1 + $0x70] sm:$0xff]  ;;  %v604_v57 = vmul.f32 %v362_v54, %v346_v55  ;;  %v603_v59 = vmul.f32 %v361_v58, %v345_v52  ;;  %v365_v60 = vld [vmem:[%s3074_s2 + $0x68] sm:$0xff]  ;;  %v351_v63 = vld [vmem:[%s3072_s1 + $0x78] sm:$0xff]  ;;  %s1811_s1 = smov 24  }
  0x11   :  { %1741 = vmatmul.msk.f32.gmra.mxu3 %vm59_vm0, %v54_v30  ;;  %v607_v61 = vmul.f32 %v365_v60, %v349_v44  ;;  %v366_v62 = vld [vmem:[%s3074_s2 + $0x70] sm:$0xff]  ;;  %v367_v0 = vld [vmem:[%s3074_s2 + $0x78] sm:$0xff]  ;;  %s1812_s2 = smov 16  }
  0x12   :  { %620 = vperm.xlu0 %1793, %v596_v13   ;;  %v609_v1 = vmul.f32 %v367_v0, %v351_v63  ;;  %v608_v2 = vmul.f32 %v366_v62, %v350_v56 }
  0x15   :  { %382 = vperm.xlu2 %1795, %v339_v15   ;;  %1730 = vmatmul.msk.f32.gmra.mxu0 %vm59_vm0, %v43_v14 }
  0x17   :  { %505 = vperm.xlu1 %1794, %v353_v7  }
  0x19   :  { %1742 = vmatmul.msk.f32.gmra.mxu3 %vm59_vm0, %v55_v33 }
  0x1a   :  { %624 = vperm.xlu0 %1793, %v597_v17  }
  0x1d   :  { %386 = vperm.xlu2 %1795, %v340_v19   ;;  %1731 = vmatmul.msk.f32.gmra.mxu0 %vm59_vm0, %v44_v18 }
  0x1f   :  { %510 = vperm.xlu1 %1794, %v354_v12  }
  0x21   :  { %1743 = vmatmul.msk.f32.gmra.mxu3 %vm59_vm0, %v56_v37 }
  0x22   :  { %628 = vperm.xlu0 %1793, %v598_v21  }
  0x25   :  { %390 = vperm.xlu2 %1795, %v341_v23   ;;  %1732 = vmatmul.msk.f32.gmra.mxu0 %vm59_vm0, %v45_v22 }
  0x27   :  { %515 = vperm.xlu1 %1794, %v355_v16  }
  0x2a   :  { %632 = vperm.xlu0 %1793, %v599_v26  }
  0x2d   :  { %394 = vperm.xlu2 %1795, %v342_v28   ;;  %1733 = vmatmul.msk.f32.gmra.mxu0 %vm59_vm0, %v46_v27 }
  0x2f   :  { %520 = vperm.xlu1 %1794, %v356_v20  }
  0x32   :  { %636 = vperm.xlu0 %1793, %v600_v31  }
  0x35   :  { %1734 = vmatmul.msk.f32.gmra.mxu0 %vm59_vm0, %v47_v32  ;;  %422 = vperm.xlu2 %1795, %v349_v44  }
  0x37   :  { %525 = vperm.xlu1 %1794, %v357_v24  }
  0x3a   :  { %398 = vperm.xlu0 %1793, %v343_v34  }
  0x3d   :  { %1735 = vmatmul.msk.f32.gmra.mxu0 %vm59_vm0, %v48_v35  ;;  %660 = vperm.xlu2 %1795, %v606_v50  }
  0x3f   :  { %530 = vperm.xlu1 %1794, %v358_v29  }
  0x42   :  { %640 = vperm.xlu0 %1793, %v601_v38  }
  0x45   :  { %1736 = vmatmul.msk.f32.gmra.mxu0 %vm59_vm0, %v49_v39  ;;  %560 = vperm.xlu2 %1795, %v364_v48  }
  0x47   :  { %535 = vperm.xlu1 %1794, %v359_v36  }
  0x4a   :  { %402 = vperm.xlu0 %1793, %v344_v40  }
  0x4d   :  { %1737 = vmatmul.msk.f32.gmra.mxu0 %vm59_vm0, %v50_v41  ;;  %652 = vperm.xlu2 %1795, %v604_v57  }
  0x4f   :  { %418 = vperm.xlu1 %1794, %v348_v42  }
  0x52   :  { %644 = vperm.xlu0 %1793, %v602_v45  }
  0x55   :  { %1738 = vmatmul.msk.f32.gmra.mxu0 %vm59_vm0, %v51_v51  ;;  %550 = vperm.xlu2 %1795, %v362_v54  }
  0x57   :  { %656 = vperm.xlu1 %1794, %v605_v49  }
  0x5a   :  { %406 = vperm.xlu0 %1793, %v345_v52  }
  0x5d   :  { %1739 = vmatmul.msk.f32.gmra.mxu0 %vm59_vm0, %v52_v53  ;;  %570 = vperm.xlu2 %1795, %v366_v62  }
  0x5f   :  { %540 = vperm.xlu1 %1794, %v360_v43  }
  0x62   :  { %414 = vperm.xlu0 %1793, %v347_v46  }
  0x67   :  { %426 = vperm.xlu1 %1794, %v350_v56  }
  0x6a   :  { %648 = vperm.xlu0 %1793, %v603_v59  }
  0x6f   :  { %545 = vperm.xlu1 %1794, %v361_v58  }
  0x72   :  { %664 = vperm.xlu0 %1793, %v607_v61  }
  0x74   :  { %v2058_v10 = vpop.permute.xlu0 %370 }
  0x77   :  { %565 = vperm.xlu1 %1794, %v365_v60  }
  0x7a   :  { %410 = vperm.xlu0 %1793, %v346_v55  }
  0x7c   :  { %v2064_v13 = vpop.permute.xlu0 %374 }
  0x7f   :  { %672 = vperm.xlu1 %1794, %v609_v1  }
  0x82   :  { %668 = vperm.xlu0 %1793, %v608_v2   ;;  %v2044_v3 = vpop.f32.mrf.mxu0 }
  0x83   :  { %v211_v16 = vmul.f32 %v2044_v3, %v2044_v3  ;;  %v174_v19 = vsel %vm173_vm1, %v2044_v3, 0.0 }
  0x84   :  { %v2098_v35 = vpop.permute.xlu0 %620 }
  0x85   :  { %v227_v25 = vsel %vm173_vm1, %v211_v16, 0.0 }
  0x87   :  { %555 = vperm.xlu1 %1794, %v363_v47  }
  0x8a   :  { %430 = vperm.xlu0 %1793, %v351_v63   ;;  %v2046_v4 = vpop.f32.mrf.mxu0  ;;  %v2129_v63 = vpop.permute.xlu1 %612 }
  0x8b   :  { %v212_v15 = vmul.f32 %v2046_v4, %v2046_v4  ;;  %v175_v17 = vsel %vm173_vm1, %v2046_v4, 0.0 }
  0x8c   :  { %v2062_v12 = vpop.f32.mrf.mxu3  ;;  %v176_v23 = vadd.f32 %v175_v17, %v174_v19 }
  0x8d   :  { %v228_v20 = vsel %vm173_vm1, %v212_v15, 0.0 }
  0x8e   :  { %v229_v29 = vadd.f32 %v228_v20, %v227_v25 }
  0x8f   :  { %575 = vperm.xlu1 %1794, %v367_v0   ;;  %v2131_v0 = vpop.permute.xlu0 %624 }
  0x92   :  { %v2048_v5 = vpop.f32.mrf.mxu0 }
  0x93   :  { %v213_v18 = vmul.f32 %v2048_v5, %v2048_v5  ;;  %v177_v21 = vsel %vm173_vm1, %v2048_v5, 0.0 }
  0x94   :  { %v2083_v24 = vpop.f32.mrf.mxu3  ;;  %v178_v30 = vadd.f32 %v177_v21, %v176_v23  ;;  %v223_v23 = vmul.f32 %v2062_v12, %v2062_v12 }
  0x95   :  { %v230_v26 = vsel %vm173_vm1, %v213_v18, 0.0 }
  0x96   :  { %v231_v36 = vadd.f32 %v230_v26, %v229_v29 }
  0x9a   :  { %v2050_v6 = vpop.f32.mrf.mxu0 }
  0x9b   :  { %v214_v22 = vmul.f32 %v2050_v6, %v2050_v6  ;;  %v179_v27 = vsel %vm173_vm1, %v2050_v6, 0.0 }
  0x9c   :  { %v180_v37 = vadd.f32 %v179_v27, %v178_v30  ;;  %v2117_v54 = vpop.f32.mrf.mxu3  ;;  %v197_v30 = vsel %vm173_vm1, %v2062_v12, 0.0 }
  0x9d   :  { %v232_v32 = vsel %vm173_vm1, %v214_v22, 0.0 }
  0x9e   :  { %v233_v41 = vadd.f32 %v232_v32, %v231_v36  ;;  %v224_v32 = vmul.f32 %v2083_v24, %v2083_v24 }
  0xa2   :  { %v2052_v7 = vpop.f32.mrf.mxu0 }
  0xa3   :  { %v215_v28 = vmul.f32 %v2052_v7, %v2052_v7  ;;  %v181_v33 = vsel %vm173_vm1, %v2052_v7, 0.0 }
  0xa4   :  { %v182_v42 = vadd.f32 %v181_v33, %v180_v37  ;;  %v2145_v29 = vpop.f32.mrf.mxu3  ;;  %v250_v37 = vsel %vm173_vm1, %v223_v23, 0.0  ;;  %v501_v23 = vpop.permute.xlu2 %500 }
  0xa5   :  { %v234_v38 = vsel %vm173_vm1, %v215_v28, 0.0 }
  0xa6   :  { %v235_v46 = vadd.f32 %v234_v38, %v233_v41  ;;  %v199_v38 = vsel %vm173_vm1, %v2083_v24, 0.0  ;;  %v2159_v41 = vpop.permute.xlu1 %616 }
  0xaa   :  { %v2054_v8 = vpop.f32.mrf.mxu0 }
  0xab   :  { %v216_v34 = vmul.f32 %v2054_v8, %v2054_v8  ;;  %v183_v39 = vsel %vm173_vm1, %v2054_v8, 0.0 }
  0xac   :  { %v184_v47 = vadd.f32 %v183_v39, %v182_v42  ;;  %v225_v39 = vmul.f32 %v2117_v54, %v2117_v54  ;;  %v2161_v42 = vpop.permute.xlu0 %628 }
  0xad   :  { %v236_v43 = vsel %vm173_vm1, %v216_v34, 0.0 }
  0xae   :  { %v237_v51 = vadd.f32 %v236_v43, %v235_v46  ;;  %v201_v46 = vsel %vm173_vm1, %v2117_v54, 0.0 }
  0xb2   :  { %v2056_v9 = vpop.f32.mrf.mxu0 }
  0xb3   :  { %v217_v40 = vmul.f32 %v2056_v9, %v2056_v9  ;;  %v185_v44 = vsel %vm173_vm1, %v2056_v9, 0.0 }
  0xb4   :  { %v186_v52 = vadd.f32 %v185_v44, %v184_v47  ;;  %v203_v47 = vsel %vm173_vm1, %v2145_v29, 0.0 }
  0xb5   :  { %v238_v48 = vsel %vm173_vm1, %v217_v40, 0.0  ;;  %v226_v40 = vmul.f32 %v2145_v29, %v2145_v29 }
  0xb6   :  { %v239_v58 = vadd.f32 %v238_v48, %v237_v51 }
  0xb7   :  { %v256_v51 = vsel %vm173_vm1, %v226_v40, 0.0 }
  0xba   :  { %v2060_v11 = vpop.f32.mrf.mxu0 }
  0xbb   :  { %v218_v45 = vmul.f32 %v2060_v11, %v2060_v11  ;;  %v187_v49 = vsel %vm173_vm1, %v2060_v11, 0.0 }
  0xbc   :  { %v188_v59 = vadd.f32 %v187_v49, %v186_v52 }
  0xbd   :  { %v240_v55 = vsel %vm173_vm1, %v218_v45, 0.0  ;;  %v252_v45 = vsel %vm173_vm1, %v224_v32, 0.0 }
  0xbe   :  { %v241_v1 = vadd.f32 %v240_v55, %v239_v58 }
  0xc2   :  { %v2066_v14 = vpop.f32.mrf.mxu0 }
  0xc3   :  { %v219_v50 = vmul.f32 %v2066_v14, %v2066_v14  ;;  %v189_v56 = vsel %vm173_vm1, %v2066_v14, 0.0 }
  0xc4   :  { %v190_v2 = vadd.f32 %v189_v56, %v188_v59 }
  0xc5   :  { %v242_v60 = vsel %vm173_vm1, %v219_v50, 0.0  ;;  %v254_v50 = vsel %vm173_vm1, %v225_v39, 0.0 }
  0xc6   :  { %v243_v17 = vadd.f32 %v242_v60, %v241_v1  ;;  %v2170_v60 = vpop.permute.xlu1 %505 }
  0xca   :  { %v2091_v31 = vpop.f32.mrf.mxu0 }
  0xcb   :  { %v220_v57 = vmul.f32 %v2091_v31, %v2091_v31  ;;  %v191_v61 = vsel %vm173_vm1, %v2091_v31, 0.0 }
  0xcc   :  { %v192_v18 = vadd.f32 %v191_v61, %v190_v2  ;;  %v2172_v61 = vpop.permute.xlu0 %632 }
  0xcd   :  { %v244_v15 = vsel %vm173_vm1, %v220_v57, 0.0 }
  0xce   :  { %v245_v20 = vadd.f32 %v244_v15, %v243_v17 }
  0xd2   :  { %v2115_v53 = vpop.f32.mrf.mxu0 }
  0xd3   :  { %v221_v62 = vmul.f32 %v2115_v53, %v2115_v53  ;;  %v193_v16 = vsel %vm173_vm1, %v2115_v53, 0.0 }
  0xd4   :  { %v194_v21 = vadd.f32 %v193_v16, %v192_v18 }
  0xd5   :  { %v246_v19 = vsel %vm173_vm1, %v221_v62, 0.0 }
  0xd6   :  { %v247_v27 = vadd.f32 %v246_v19, %v245_v20 }
  0xda   :  { %v2137_v22 = vpop.f32.mrf.mxu0 }
  0xdb   :  { %v195_v25 = vsel %vm173_vm1, %v2137_v22, 0.0  ;;  %v222_v26 = vmul.f32 %v2137_v22, %v2137_v22 }
  0xdc   :  { %v196_v28 = vadd.f32 %v195_v25, %v194_v21  ;;  %v2174_v25 = vpop.permute.xlu1 %510 }
  0xdd   :  { %v248_v33 = vsel %vm173_vm1, %v222_v26, 0.0  ;;  %v2176_v26 = vpop.permute.xlu0 %636 }
  0xde   :  { %v198_v34 = vadd.f32 %v197_v30, %v196_v28  ;;  %v249_v36 = vadd.f32 %v248_v33, %v247_v27  ;;  %v2178_v33 = vpop.permute.xlu2 %378 }
  0xe0   :  { %v251_v43 = vadd.f32 %v250_v37, %v249_v36  ;;  %v200_v44 = vadd.f32 %v199_v38, %v198_v34 }
  0xe2   :  { %v202_v48 = vadd.f32 %v201_v46, %v200_v44  ;;  %v253_v49 = vadd.f32 %v252_v45, %v251_v43 }
  0xe4   :  { %v255_v52 = vadd.f32 %v254_v50, %v253_v49  ;;  %v204_v55 = vadd.f32 %v203_v47, %v202_v48  ;;  %v2180_v34 = vpop.permute.xlu1 %515  ;;  %v264_v47 = vld [vmem:[%s3075_s4] sm:$0x1]  ;;  %s1803_s4 = smov 8  }
  0xe5   :  { %v2182_v36 = vpop.permute.xlu0 %398 }
  0xe6   :  { %v205_v56 = vrot.slane %v204_v55, 4  ;;  %v257_v57 = vadd.f32 %v256_v51, %v255_v52  ;;  %v2184_v43 = vpop.permute.xlu2 %382  ;;  %v265_v51 = vld [vmem:[%s3076_s5] sm:$0x1]  ;;  %s1804_s5 = smov 4  }
  0xe8   :  { %v206_v58 = vadd.f32 %v205_v56, %v204_v55  ;;  %v258_v59 = vrot.slane %v257_v57, 4 }
  0xea   :  { %v207_v62 = vrot.slane %v206_v58, 2  ;;  %v259_v1 = vadd.f32 %v258_v59, %v257_v57 }
  0xec   :  { %v208_v2 = vadd.f32 %v207_v62, %v206_v58  ;;  %v260_v15 = vrot.slane %v259_v1, 2  ;;  %v521_v45 = vpop.permute.xlu1 %520 }
  0xed   :  { %v2186_v46 = vpop.permute.xlu0 %640 }
  0xee   :  { %v209_v16 = vrot.slane %v208_v2, 1  ;;  %v261_v17 = vadd.f32 %v260_v15, %v259_v1  ;;  %v2196_v57 = vpop.permute.xlu2 %386 }
  0xf0   :  { %v210_v18 = vadd.f32 %v209_v16, %v208_v2  ;;  %v262_v19 = vrot.slane %v261_v17, 1 }
  0xf2   :  { %v263_v20 = vadd.f32 %v262_v19, %v261_v17  ;;  %v266_v21 = vmul.f32 0.0078125, %v210_v18 }
  0xf4   :  { %v267_v27 = vmul.f32 0.0078125, %v263_v20  ;;  %v268_v28 = vmul.f32 %v266_v21, %v266_v21  ;;  %v2200_v59 = vpop.permute.xlu1 %525 }
  0xf5   :  { %v2202_v62 = vpop.permute.xlu0 %402 }
  0xf6   :  { %v269_v30 = vsub.f32 %v267_v27, %v268_v28 }
  0xf8   :  { %v270_v32 = vadd.f32 1e-05, %v269_v30 }
  0xfa   :  { %1796 = vrsqrt.f32 %v270_v32  ;;  %vm277_vm3 = vweird.f32 %v270_v32 }
 0x100   :  { %v1797_v37 = vpop.eup %1796 }
 0x101   :  { %v272_v38 = vmul.f32 %v1797_v37, %v270_v32  ;;  %vm278_vm2 = vweird.f32 %v1797_v37 }
 0x102   :  { %vm279_vm4 = vmor %vm277_vm3, %vm278_vm2 }
 0x103   :  { %v273_v39 = vmul.f32 %v1797_v37, %v272_v38  ;;  %v391_v38 = vpop.permute.xlu2 %390 }
 0x105   :  { %v274_v40 = vmul.f32 0.5, %v273_v39 }
 0x107   :  { %v275_v44 = vsub.f32 1.5, %v274_v40 }
 0x109   :  { %v276_v48 = vmul.f32 %v1797_v37, %v275_v44 }
 0x10b   :  { %v280_v49 = vsel %vm279_vm4, %v1797_v37, %v276_v48  ;;  %v2256_v48 = vpop.permute.xlu0 %644 }
 0x10c   :  { %v281_v50 = vmul.f32 %v280_v49, %v264_v47  ;;  %v674_v47 = vrot.slane %v2129_v63, 7 }
 0x10e   :  { %v282_v52 = vmul.f32 %v281_v50, %v266_v21  ;;  %v2194_v55 = vperm.slane %v281_v50, 0  ;;  %v681_v50 = vrot.slane %v2161_v42, 7 }
 0x110   :  { %v283_v56 = vsub.f32 %v265_v51, %v282_v52  ;;  %v296_v58 = vmul.f32 %v2194_v55, %v2137_v22  ;;  %v300_v1 = vmul.f32 %v2194_v55, %v2145_v29  ;;  %v299_v15 = vmul.f32 %v2194_v55, %v2117_v54 }
 0x111   :  { %v297_v16 = vmul.f32 %v2194_v55, %v2062_v12  ;;  %v290_v17 = vmul.f32 %v2194_v55, %v2054_v8  ;;  %v286_v22 = vmul.f32 %v2194_v55, %v2046_v4  ;;  %v433_v8 = vrot.slane %v2058_v10, 7 }
 0x112   :  { %v2206_v2 = vperm.slane %v283_v56, 0  ;;  %v434_v4 = vrot.slane %v2064_v13, 7  ;;  %v285_v28 = vmul.f32 %v2194_v55, %v2044_v3  ;;  %v292_v32 = vmul.f32 %v2194_v55, %v2060_v11  ;;  %v531_v11 = vpop.permute.xlu1 %530 }
 0x113   :  { %v287_v10 = vmul.f32 %v2194_v55, %v2048_v5  ;;  %v289_v37 = vmul.f32 %v2194_v55, %v2052_v7  ;;  %v675_v51 = vrot.slane %v2159_v41, 7 }
 0x114   :  { %v2217_v18 = vadd.f32 %v2206_v2, %v300_v1  ;;  %v2220_v19 = vadd.f32 %v2206_v2, %v299_v15  ;;  %v2223_v29 = vadd.f32 %v2206_v2, %v296_v58  ;;  %v2226_v54 = vadd.f32 %v2206_v2, %v297_v16 }
 0x115   :  { %v309_v12 = vadd.f32 %v2206_v2, %v290_v17  ;;  %v305_v20 = vadd.f32 %v2206_v2, %v286_v22  ;;  %v435_v30 = vsel %vm432_vm5, %v433_v8, %v434_v4  ;;  %v2250_v3 = vadd.f32 %v2206_v2, %v285_v28 }
 0x116   :  { %v311_v5 = vadd.f32 %v2206_v2, %v292_v32  ;;  %v306_v7 = vadd.f32 %v2206_v2, %v287_v10  ;;  %v308_v49 = vadd.f32 %v2206_v2, %v289_v37  ;;  %v288_v15 = vmul.f32 %v2194_v55, %v2050_v6 }
 0x117   :  { %v2232_v21 = vmax.f32 %v309_v12, 0.0  ;;  %v2234_v27 = vmax.f32 %v305_v20, 0.0  ;;  %v320_v63 = vmax.f32 %v2250_v3, 0.0  ;;  %v676_v16 = vsel %vm432_vm5, %v674_v47, %v675_v51 }
 0x118   :  { %v2271_v58 = vmax.f32 %v311_v5, 0.0  ;;  %v2273_v1 = vmax.f32 %v306_v7, 0.0  ;;  %v307_v20 = vadd.f32 %v2206_v2, %v288_v15  ;;  %v2313_v5 = vpop.permute.xlu0 %406 }
 0x119   :  { %v582_v39 = vmul.f32 %v521_v45, %v2232_v21  ;;  %v578_v40 = vmul.f32 %v501_v23, %v2234_v27  ;;  %v2253_v44 = vmul.f32 %v435_v30, %v2234_v27  ;;  %v677_v45 = vrot.slane %v2098_v35, 7 }
 0x11a   :  { %v679_v23 = vrot.slane %v2131_v0, 7  ;;  %v481_v52 = vmul.f32 %v433_v8, %v320_v63  ;;  %v2275_v0 = vmax.f32 %v308_v49, 0.0  ;;  %v722_v12 = vmul.f32 %v674_v47, %v2234_v27  ;;  %v395_v47 = vpop.permute.xlu2 %394 }
 0x11b   :  { %862 = vrot.lane.b32.xlu0 %v582_v39, %s1803_s4  ;;  %854 = vrot.lane.b32.xlu1 %v578_v40, %s1803_s4  ;;  %v758_v56 = vrot.slane %v2253_v44, 1  ;;  %v291_v8 = vmul.f32 %v2194_v55, %v2056_v9  ;;  %v584_v28 = vmul.f32 %v531_v11, %v2271_v58  ;;  %v579_v30 = vmul.f32 %v2170_v60, %v2273_v1  ;;  %v2311_v11 = vpop.permute.xlu1 %535 }
 0x11c   :  { %v680_v41 = vsel %vm432_vm5, %v677_v45, %v679_v23  ;;  %v682_v17 = vsel %vm432_vm5, %v679_v23, %v681_v50  ;;  %v757_v22 = vrot.slane %v481_v52, 1  ;;  %v2297_v32 = vmul.f32 %v676_v16, %v2273_v1 }
 0x11d   :  { %v2301_v10 = vmul.f32 %v680_v41, %v2275_v0  ;;  %v2304_v9 = vmul.f32 %v682_v17, %v2232_v21  ;;  %v310_v37 = vadd.f32 %v2206_v2, %v291_v8  ;;  %v440_v39 = vrot.slane %v2196_v57, 7 }
 0x11e   :  { %v759_v6 = vsel %vm756_vm6, %v757_v22, %v758_v56  ;;  %v442_v40 = vrot.slane %v391_v38, 7  ;;  %v436_v60 = vrot.slane %v2178_v33, 7  ;;  %v444_v7 = vrot.slane %v395_v47, 7 }
 0x11f   :  { %790 = vrot.lane.b32.xlu2 %v759_v6, %s1804_s5  ;;  %v919_v49 = vrot.slane %v722_v12, 1  ;;  %v920_v23 = vrot.slane %v2297_v32, 1  ;;  %v2316_v52 = vmax.f32 %v307_v20, 0.0  ;;  %v924_v15 = vrot.slane %v2301_v10, 1 }
 0x120   :  { %v926_v38 = vrot.slane %v2304_v9, 1  ;;  %v2320_v16 = vmax.f32 %v310_v37, 0.0  ;;  %v443_v33 = vsel %vm432_vm5, %v440_v39, %v442_v40  ;;  %v445_v41 = vsel %vm432_vm5, %v442_v40, %v444_v7  ;;  %v2354_v32 = vpop.permute.xlu0 %414 }
 0x121   :  { %v437_v17 = vsel %vm432_vm5, %v434_v4, %v436_v60  ;;  %v921_v22 = vsel %vm756_vm6, %v919_v49, %v920_v23  ;;  %v580_v12 = vmul.f32 %v2174_v25, %v2316_v52  ;;  %v2342_v13 = vmul.f32 %v443_v33, %v2232_v21 }
 0x122   :  { %v2333_v20 = vmul.f32 %v437_v17, %v2273_v1  ;;  %v927_v8 = vsel %vm756_vm6, %v924_v15, %v926_v38  ;;  %v2345_v4 = vmul.f32 %v445_v41, %v2320_v16  ;;  %v683_v25 = vrot.slane %v2172_v61, 7 }
 0x123   :  { %866 = vrot.lane.b32.xlu0 %v584_v28, %s1803_s4  ;;  %856 = vrot.lane.b32.xlu1 %v579_v30, %s1803_s4  ;;  %v685_v6 = vrot.slane %v2176_v26, 7  ;;  %v2352_v30 = vpop.permute.xlu1 %418  ;;  %v766_v37 = vrot.slane %v2342_v13, 1  ;;  %v678_v47 = vsel %vm432_vm5, %v675_v51, %v677_v45  ;;  %v438_v49 = vrot.slane %v2184_v43, 7 }
 0x124   :  { %v760_v28 = vrot.slane %v2333_v20, 1  ;;  %v768_v40 = vrot.slane %v2345_v4, 1  ;;  %v684_v61 = vsel %vm432_vm5, %v681_v50, %v683_v25  ;;  %v293_v33 = vmul.f32 %v2194_v55, %v2066_v14  ;;  %v2392_v50 = vpop.permute.xlu2 %422 }
 0x125   :  { %v686_v41 = vsel %vm432_vm5, %v683_v25, %v685_v6  ;;  %v581_v35 = vmul.f32 %v2180_v34, %v2275_v0  ;;  %v724_v42 = vmul.f32 %v678_v47, %v2316_v52  ;;  %v2383_v43 = vmul.f32 %v684_v61, %v2320_v16 }
 0x126   :  { %v761_v17 = vsel %vm756_vm6, %v758_v56, %v760_v28  ;;  %v769_v14 = vsel %vm756_vm6, %v766_v37, %v768_v40  ;;  %v2386_v44 = vmul.f32 %v686_v41, %v2271_v58  ;;  %v312_v45 = vadd.f32 %v2206_v2, %v293_v33 }
 0x127   :  { %952 = vrot.lane.b32.xlu2 %v921_v22, %s1805_s27  ;;  %v446_v34 = vrot.slane %v2182_v36, 7  ;;  %v448_v51 = vrot.slane %v2202_v62, 7  ;;  %v922_v56 = vrot.slane %v724_v42, 1  ;;  %v439_v22 = vsel %vm432_vm5, %v436_v60, %v438_v49 }
 0x128   :  { %v930_v20 = vrot.slane %v2386_v44, 1  ;;  %v2403_v61 = vpop.permute.xlu0 %648  ;;  %v294_v36 = vmul.f32 %v2194_v55, %v2091_v31  ;;  %v583_v60 = vmul.f32 %v2200_v59, %v2320_v16  ;;  %v484_v41 = vmul.f32 %v439_v22, %v2316_v52 }
 0x129   :  { %v447_v47 = vsel %vm432_vm5, %v444_v7, %v446_v34  ;;  %v449_v62 = vsel %vm432_vm5, %v446_v34, %v448_v51  ;;  %v923_v33 = vsel %vm756_vm6, %v920_v23, %v922_v56  ;;  %v450_v59 = vrot.slane %v2313_v5, 7 }
 0x12a   :  { %v313_v23 = vadd.f32 %v2206_v2, %v294_v36  ;;  %v295_v22 = vmul.f32 %v2194_v55, %v2115_v53  ;;  %v925_v57 = vsel %vm756_vm6, %v922_v56, %v924_v15  ;;  %v2545_v4 = vmax.f32 %v2217_v18, 0.0 }
 0x12b   :  { %958 = vrot.lane.b32.xlu0 %v927_v8, %s1805_s27  ;;  %858 = vrot.lane.b32.xlu1 %v580_v12, %s1803_s4  ;;  %v928_v12 = vrot.slane %v2383_v43, 1  ;;  %v2398_v8 = vmax.f32 %v312_v45, 0.0  ;;  %v2400_v25 = vpop.permute.xlu1 %656 }
 0x12c   :  { %v2426_v42 = vpop.permute.xlu2 %660  ;;  %v2429_v34 = vmax.f32 %v313_v23, 0.0 }
 0x12d   :  { %v931_v7 = vsel %vm756_vm6, %v928_v12, %v930_v20  ;;  %v489_v31 = vmul.f32 %v449_v62, %v2398_v8  ;;  %v585_v62 = vmul.f32 %v2311_v11, %v2398_v8  ;;  %v689_v11 = vrot.slane %v2256_v48, 7 }
 0x12f   :  { %792 = vrot.lane.b32.xlu2 %v761_v17, %s1804_s5  ;;  %v2419_v17 = vmul.f32 %v447_v47, %v2271_v58  ;;  %v772_v45 = vrot.slane %v489_v31, 1  ;;  %v451_v47 = vsel %vm432_vm5, %v448_v51, %v450_v59  ;;  %v691_v51 = vrot.slane %v2403_v61, 7 }
 0x130   :  { %v2437_v5 = vpop.permute.xlu0 %664  ;;  %v490_v53 = vmul.f32 %v451_v47, %v2429_v34 }
 0x132   :  { %v774_v23 = vrot.slane %v490_v53, 1 }
 0x133   :  { %800 = vrot.lane.b32.xlu0 %v769_v14, %s1804_s5  ;;  %860 = vrot.lane.b32.xlu1 %v581_v35, %s1803_s4  ;;  %v762_v35 = vrot.slane %v484_v41, 1  ;;  %v770_v14 = vrot.slane %v2419_v17, 1  ;;  %v1051_v17 = vld [vmem:[%s3077_s6 + $0x8] sm:$0xff] }
 0x134   :  { %1114 = vmatpush.msra.mxu1 %v1051_v17  ;;  %1778 = vmatpush.msrb.mxu3 %v1051_v17 }
 0x135   :  { %v763_v36 = vsel %vm756_vm6, %v760_v28, %v762_v35  ;;  %v773_v41 = vsel %vm756_vm6, %v770_v14, %v772_v45  ;;  %v687_v28 = vrot.slane %v2186_v46, 7 }
 0x137   :  { %954 = vrot.lane.b32.xlu2 %v923_v33, %s1805_s27  ;;  %v541_v33 = vpop.permute.xlu1 %540  ;;  %v690_v47 = vsel %vm432_vm5, %v687_v28, %v689_v11  ;;  %v688_v9 = vsel %vm432_vm5, %v685_v6, %v687_v28  ;;  %v456_v6 = vrot.slane %v2352_v30, 7 }
 0x138   :  { %v411_v10 = vpop.permute.xlu0 %410 }
 0x139   :  { %v452_v56 = vrot.slane %v411_v10, 7 }
 0x13b   :  { %962 = vrot.lane.b32.xlu0 %v931_v7, %s1805_s27  ;;  %864 = vrot.lane.b32.xlu1 %v583_v60, %s1803_s4  ;;  %v314_v60 = vadd.f32 %v2206_v2, %v295_v22  ;;  %v441_v7 = vsel %vm432_vm5, %v438_v49, %v440_v39  ;;  %v298_v22 = vmul.f32 %v2194_v55, %v2083_v24 }
 0x13c   :  { %v586_v39 = vmul.f32 %v541_v33, %v2429_v34  ;;  %v485_v49 = vmul.f32 %v441_v7, %v2275_v0  ;;  %v775_v24 = vsel %vm756_vm6, %v772_v45, %v774_v23  ;;  %v2470_v55 = vmul.f32 %v690_v47, %v2429_v34 }
 0x13d   :  { %v2453_v31 = vmax.f32 %v314_v60, 0.0  ;;  %v317_v48 = vadd.f32 %v2206_v2, %v298_v22  ;;  %v453_v53 = vsel %vm432_vm5, %v450_v59, %v452_v56 }
 0x13e   :  { %v764_v33 = vrot.slane %v485_v49, 1  ;;  %v934_v60 = vrot.slane %v2470_v55, 1 }
 0x13f   :  { %794 = vrot.lane.b32.xlu2 %v763_v36, %s1804_s5  ;;  %v692_v36 = vsel %vm432_vm5, %v689_v11, %v691_v51  ;;  %v2475_v2 = vpop.permute.xlu1 %426  ;;  %v2477_v15 = vmax.f32 %v317_v48, 0.0  ;;  %v491_v7 = vmul.f32 %v453_v53, %v2453_v31 }
 0x140   :  { %v731_v61 = vmul.f32 %v692_v36, %v2453_v31  ;;  %v765_v11 = vsel %vm756_vm6, %v762_v35, %v764_v33 }
 0x141   :  { %v776_v59 = vrot.slane %v491_v7, 1 }
 0x143   :  { %804 = vrot.lane.b32.xlu0 %v773_v41, %s1804_s5  ;;  %868 = vrot.lane.b32.xlu1 %v585_v62, %s1803_s4  ;;  %v561_v62 = vpop.permute.xlu2 %560  ;;  %v936_v41 = vrot.slane %v731_v61, 1 }
 0x144   :  { %v590_v45 = vmul.f32 %v561_v62, %v2477_v15  ;;  %v2491_v62 = vmax.f32 %v2223_v29, 0.0  ;;  %v454_v29 = vrot.slane %v2354_v32, 7 }
 0x145   :  { %v937_v47 = vsel %vm756_vm6, %v934_v60, %v936_v41 }
 0x146   :  { %v455_v10 = vsel %vm432_vm5, %v452_v56, %v454_v29  ;;  %v2521_v56 = vmax.f32 %v2226_v54, 0.0  ;;  %v729_v54 = vmul.f32 %v688_v9, %v2398_v8  ;;  %v457_v53 = vsel %vm432_vm5, %v454_v29, %v456_v6 }
 0x147   :  { %956 = vrot.lane.b32.xlu2 %v925_v57, %s1805_s27  ;;  %v546_v48 = vpop.permute.xlu1 %545  ;;  %v767_v57 = vsel %vm756_vm6, %v764_v33, %v766_v37  ;;  %v492_v33 = vmul.f32 %v455_v10, %v2491_v62 }
 0x148   :  { %v493_v7 = vmul.f32 %v457_v53, %v2521_v56 }
 0x149   :  { %v778_v43 = vrot.slane %v492_v33, 1 }
 0x14a   :  { %v780_v44 = vrot.slane %v493_v7, 1 }
 0x14b   :  { %806 = vrot.lane.b32.xlu0 %v775_v24, %s1804_s5  ;;  %870 = vrot.lane.b32.xlu1 %v586_v39, %s1803_s4  ;;  %v653_v22 = vpop.permute.xlu2 %652  ;;  %v587_v39 = vmul.f32 %v546_v48, %v2453_v31  ;;  %v777_v24 = vsel %vm756_vm6, %v774_v23, %v776_v59  ;;  %v929_v23 = vsel %vm756_vm6, %v926_v38, %v928_v12 }
 0x14c   :  { %v693_v36 = vrot.slane %v653_v22, 7  ;;  %v779_v26 = vsel %vm756_vm6, %v776_v59, %v778_v43  ;;  %v1050_v22 = vld [vmem:[%s3077_s6] sm:$0xff]  ;;  %s1806_s6 = smov 120  }
 0x14d   :  { %1115 = vmatpush.msra.mxu1 %v1050_v22  ;;  %1779 = vmatpush.msrb.mxu3 %v1050_v22 }
 0x14e   :  { %v694_v35 = vsel %vm432_vm5, %v691_v51, %v693_v36  ;;  %v2505_v51 = vmax.f32 %v2220_v19, 0.0 }
 0x14f   :  { %796 = vrot.lane.b32.xlu2 %v765_v11, %s1804_s5  ;;  %v732_v49 = vmul.f32 %v694_v35, %v2491_v62  ;;  %v566_v61 = vpop.permute.xlu1 %565 }
 0x150   :  { %v591_v37 = vmul.f32 %v566_v61, %v2505_v51 }
 0x151   :  { %v938_v13 = vrot.slane %v732_v49, 1 }
 0x153   :  { %968 = vrot.lane.b32.xlu0 %v937_v47, %s1805_s27  ;;  %878 = vrot.lane.b32.xlu1 %v590_v45, %s1803_s4  ;;  %v939_v32 = vsel %vm756_vm6, %v936_v41, %v938_v13  ;;  %v551_v19 = vpop.permute.xlu2 %550  ;;  %v695_v45 = vrot.slane %v2400_v25, 7  ;;  %v771_v25 = vsel %vm756_vm6, %v768_v40, %v770_v14  ;;  %v932_v40 = vrot.slane %v729_v54, 1 }
 0x154   :  { %v588_v12 = vmul.f32 %v551_v19, %v2491_v62  ;;  %v458_v47 = vrot.slane %v2392_v50, 7  ;;  %v781_v50 = vsel %vm756_vm6, %v778_v43, %v780_v44 }
 0x155   :  { %v696_v38 = vsel %vm432_vm5, %v693_v36, %v695_v45  ;;  %v933_v30 = vsel %vm756_vm6, %v930_v20, %v932_v40  ;;  %v697_v20 = vrot.slane %v2426_v42, 7  ;;  %v699_v42 = vrot.slane %v2437_v5, 7 }
 0x156   :  { %v733_v46 = vmul.f32 %v696_v38, %v2521_v56  ;;  %v459_v48 = vsel %vm432_vm5, %v456_v6, %v458_v47 }
 0x157   :  { %798 = vrot.lane.b32.xlu2 %v767_v57, %s1804_s5  ;;  %v2536_v41 = vpop.permute.xlu1 %672  ;;  %v698_v59 = vsel %vm432_vm5, %v695_v45, %v697_v20  ;;  %v935_v57 = vsel %vm756_vm6, %v932_v40, %v934_v60  ;;  %v700_v60 = vsel %vm432_vm5, %v697_v20, %v699_v42  ;;  %v460_v45 = vrot.slane %v2475_v2, 7 }
 0x158   :  { %v940_v28 = vrot.slane %v733_v46, 1  ;;  %v734_v49 = vmul.f32 %v698_v59, %v2477_v15 }
 0x159   :  { %v461_v43 = vsel %vm432_vm5, %v458_v47, %v460_v45 }
 0x15a   :  { %v941_v18 = vsel %vm756_vm6, %v938_v13, %v940_v28  ;;  %v942_v61 = vrot.slane %v734_v49, 1  ;;  %v495_v38 = vmul.f32 %v461_v43, %v2505_v51 }
 0x15b   :  { %808 = vrot.lane.b32.xlu0 %v777_v24, %s1804_s5  ;;  %872 = vrot.lane.b32.xlu1 %v587_v39, %s1803_s4  ;;  %v571_v14 = vpop.permute.xlu2 %570  ;;  %v494_v39 = vmul.f32 %v459_v48, %v2477_v15  ;;  %v669_v24 = vpop.permute.xlu0 %668 }
 0x15c   :  { %v592_v11 = vmul.f32 %v571_v14, %v2545_v4  ;;  %v943_v33 = vsel %vm756_vm6, %v940_v28, %v942_v61  ;;  %v784_v2 = vrot.slane %v495_v38, 1 }
 0x15d   :  { %v782_v13 = vrot.slane %v494_v39, 1 }
 0x15f   :  { %960 = vrot.lane.b32.xlu2 %v929_v23, %s1805_s27  ;;  %v556_v36 = vpop.permute.xlu1 %555  ;;  %v783_v23 = vsel %vm756_vm6, %v780_v44, %v782_v13  ;;  %v785_v28 = vsel %vm756_vm6, %v782_v13, %v784_v2 }
 0x160   :  { %v589_v35 = vmul.f32 %v556_v36, %v2521_v56 }
 0x163   :  { %970 = vrot.lane.b32.xlu0 %v939_v32, %s1805_s27  ;;  %880 = vrot.lane.b32.xlu1 %v591_v37, %s1803_s4  ;;  %v735_v37 = vmul.f32 %v700_v60, %v2505_v51  ;;  %v431_v32 = vpop.permute.xlu0 %430 }
 0x164   :  { %v462_v3 = vrot.slane %v431_v32, 7 }
 0x165   :  { %v944_v19 = vrot.slane %v735_v37, 1 }
 0x166   :  { %v463_v47 = vsel %vm432_vm5, %v460_v45, %v462_v3  ;;  %v497_v60 = vmul.f32 0.0, %v462_v3 }
 0x167   :  { %802 = vrot.lane.b32.xlu2 %v771_v25, %s1804_s5  ;;  %v576_v55 = vpop.permute.xlu1 %575  ;;  %v945_v9 = vsel %vm756_vm6, %v942_v61, %v944_v19  ;;  %v496_v36 = vmul.f32 %v463_v47, %v2545_v4 }
 0x168   :  { %v593_v10 = vmul.f32 0.0, %v576_v55 }
 0x16b   :  { %810 = vrot.lane.b32.xlu0 %v779_v26, %s1804_s5  ;;  %874 = vrot.lane.b32.xlu1 %v588_v12, %s1803_s4  ;;  %v701_v12 = vrot.slane %v669_v24, 7 }
 0x16d   :  { %v702_v17 = vsel %vm432_vm5, %v699_v42, %v701_v12 }
 0x16e   :  { %v736_v14 = vmul.f32 %v702_v17, %v2545_v4 }
 0x16f   :  { %964 = vrot.lane.b32.xlu2 %v933_v30, %s1805_s27 }
 0x173   :  { %972 = vrot.lane.b32.xlu0 %v941_v18, %s1805_s27  ;;  %882 = vrot.lane.b32.xlu1 %v592_v11, %s1803_s4  ;;  %v946_v18 = vrot.slane %v736_v14, 1 }
 0x175   :  { %v947_v44 = vsel %vm756_vm6, %v944_v19, %v946_v18 }
 0x177   :  { %966 = vrot.lane.b32.xlu2 %v935_v57, %s1805_s27 }
 0x179   :  { %v791_v29 = vpop.permute.xlu2 %790 }
 0x17a   :  { %v1000_v54 = vsel %vm173_vm1, %v320_v63, %v791_v29 }
 0x17b   :  { %812 = vrot.lane.b32.xlu0 %v781_v50, %s1804_s5  ;;  %876 = vrot.lane.b32.xlu1 %v589_v35, %s1803_s4  ;;  %v786_v35 = vrot.slane %v496_v36, 1 }
 0x17d   :  { %v787_v39 = vsel %vm756_vm6, %v784_v2, %v786_v35 }
 0x17f   :  { %814 = vrot.lane.b32.xlu2 %v783_v23, %s1804_s5 }
 0x181   :  { %v953_v5 = vpop.permute.xlu2 %952 }
 0x183   :  { %974 = vrot.lane.b32.xlu0 %v943_v33, %s1805_s27  ;;  %884 = vrot.lane.b32.xlu1 %v593_v10, %s1803_s4 }
 0x187   :  { %976 = vrot.lane.b32.xlu2 %v945_v9, %s1805_s27 }
 0x189   :  { %v793_v25 = vpop.permute.xlu2 %792 }
 0x18a   :  { %v1001_v53 = vsel %vm173_vm1, %v2234_v27, %v793_v25  ;;  %v703_v27 = vrot.slane %v2536_v41, 7 }
 0x18c   :  { %v704_v57 = vsel %vm432_vm5, %v701_v12, %v703_v27  ;;  %v738_v19 = vmul.f32 0.0, %v703_v27 }
 0x18d   :  { %v2593_v46 = vpop.permute.xlu0 %862  ;;  %v855_v26 = vpop.permute.xlu1 %854  ;;  %v737_v50 = vmul.f32 0.0, %v704_v57 }
 0x18e   :  { %v1017_v6 = vsel %vm1016_vm7, %v1000_v54, %v855_v26  ;;  %v950_v9 = vrot.slane %v738_v19, 1 }
 0x18f   :  { %v1034_v40 = vsel %vm1033_vm8, %v1017_v6, %v953_v5  ;;  %816 = vrot.lane.b32.xlu2 %v785_v28, %s1804_s5  ;;  %v948_v55 = vrot.slane %v737_v50, 1  ;;  %v788_v5 = vrot.slane %v497_v60, 1 }
 0x190   :  { %1744 = vmatmul.msk.f32.vlgmr.msra.gmra.mxu1 %vm59_vm0, %v1034_v40 }
 0x191   :  { %v955_v63 = vpop.permute.xlu2 %954  ;;  %v949_v61 = vsel %vm756_vm6, %v946_v18, %v948_v55  ;;  %v789_v45 = vsel %vm756_vm6, %v786_v35, %v788_v5  ;;  %v951_v25 = vsel %vm756_vm6, %v948_v55, %v950_v9 }
 0x195   :  { %v2604_v11 = vpop.permute.xlu0 %866  ;;  %v857_v30 = vpop.permute.xlu1 %856 }
 0x196   :  { %v1018_v7 = vsel %vm1016_vm7, %v1001_v53, %v857_v30 }
 0x197   :  { %v1035_v22 = vsel %vm1033_vm8, %v1018_v7, %v955_v63  ;;  %978 = vrot.lane.b32.xlu2 %v947_v44, %s1805_s27 }
 0x198   :  { %1745 = vmatmul.msk.f32.gmra.mxu1 %vm59_vm0, %v1035_v22 }
 0x199   :  { %v795_v20 = vpop.permute.xlu2 %794 }
 0x19a   :  { %v1002_v49 = vsel %vm173_vm1, %v2273_v1, %v795_v20 }
 0x19d   :  { %v959_v48 = vpop.permute.xlu0 %958  ;;  %v859_v59 = vpop.permute.xlu1 %858 }
 0x19e   :  { %v1019_v24 = vsel %vm1016_vm7, %v1002_v49, %v859_v59 }
 0x19f   :  { %818 = vrot.lane.b32.xlu2 %v787_v39, %s1804_s5 }
 0x1a1   :  { %v957_v42 = vpop.permute.xlu2 %956 }
 0x1a2   :  { %v1036_v29 = vsel %vm1033_vm8, %v1019_v24, %v957_v42 }
 0x1a3   :  { %1746 = vmatmul.msk.f32.gmra.mxu1 %vm59_vm0, %v1036_v29 }
 0x1a5   :  { %v801_v41 = vpop.permute.xlu0 %800  ;;  %v861_v13 = vpop.permute.xlu1 %860 }
 0x1a6   :  { %v1005_v17 = vsel %vm173_vm1, %v2232_v21, %v801_v41 }
 0x1a7   :  { %980 = vrot.lane.b32.xlu2 %v949_v61, %s1805_s27 }
 0x1a9   :  { %v797_v37 = vpop.permute.xlu2 %796 }
 0x1aa   :  { %v1003_v10 = vsel %vm173_vm1, %v2316_v52, %v797_v37 }
 0x1ab   :  { %v1020_v33 = vsel %vm1016_vm7, %v1003_v10, %v861_v13 }
 0x1ac   :  { %v1037_v32 = vsel %vm1033_vm8, %v1020_v33, %v959_v48 }
 0x1ad   :  { %v963_v1 = vpop.permute.xlu0 %962  ;;  %v865_v23 = vpop.permute.xlu1 %864  ;;  %1747 = vmatmul.msk.f32.gmra.mxu1 %vm59_vm0, %v1037_v32 }
 0x1ae   :  { %v1022_v14 = vsel %vm1016_vm7, %v1005_v17, %v865_v23 }
 0x1af   :  { %820 = vrot.lane.b32.xlu2 %v789_v45, %s1804_s5  ;;  %v1039_v28 = vsel %vm1033_vm8, %v1022_v14, %v963_v1 }
 0x1b1   :  { %v799_v43 = vpop.permute.xlu2 %798 }
 0x1b2   :  { %v1004_v52 = vsel %vm173_vm1, %v2275_v0, %v799_v43 }
 0x1b3   :  { %v1021_v26 = vsel %vm1016_vm7, %v1004_v52, %v2593_v46 }
 0x1b5   :  { %v805_v38 = vpop.permute.xlu0 %804  ;;  %v869_v12 = vpop.permute.xlu1 %868 }
 0x1b6   :  { %v1007_v22 = vsel %vm173_vm1, %v2271_v58, %v805_v38 }
 0x1b7   :  { %982 = vrot.lane.b32.xlu2 %v951_v25, %s1805_s27  ;;  %v1024_v47 = vsel %vm1016_vm7, %v1007_v22, %v869_v12 }
 0x1b9   :  { %v961_v54 = vpop.permute.xlu2 %960 }
 0x1ba   :  { %v1038_v2 = vsel %vm1033_vm8, %v1021_v26, %v961_v54 }
 0x1bb   :  { %1748 = vmatmul.msk.f32.gmra.mxu1 %vm59_vm0, %v1038_v2 }
 0x1bd   :  { %v807_v6 = vpop.permute.xlu0 %806  ;;  %v871_v40 = vpop.permute.xlu1 %870 }
 0x1c1   :  { %v803_v0 = vpop.permute.xlu2 %802 }
 0x1c2   :  { %v1006_v46 = vsel %vm173_vm1, %v2320_v16, %v803_v0 }
 0x1c3   :  { %1749 = vmatmul.msk.f32.gmra.mxu1 %vm59_vm0, %v1039_v28  ;;  %v1023_v30 = vsel %vm1016_vm7, %v1006_v46, %v2604_v11  ;;  %v1008_v11 = vsel %vm173_vm1, %v2398_v8, %v807_v6 }
 0x1c4   :  { %v1025_v20 = vsel %vm1016_vm7, %v1008_v11, %v871_v40 }
 0x1c5   :  { %v969_v3 = vpop.permute.xlu0 %968  ;;  %v879_v63 = vpop.permute.xlu1 %878 }
 0x1c6   :  { %v1042_v59 = vsel %vm1033_vm8, %v1025_v20, %v969_v3 }
 0x1c9   :  { %v965_v53 = vpop.permute.xlu2 %964 }
 0x1ca   :  { %v1040_v18 = vsel %vm1033_vm8, %v1023_v30, %v965_v53 }
 0x1cb   :  { %1750 = vmatmul.msk.f32.gmra.mxu1 %vm59_vm0, %v1040_v18 }
 0x1cd   :  { %v809_v7 = vpop.permute.xlu0 %808  ;;  %v873_v21 = vpop.permute.xlu1 %872 }
 0x1ce   :  { %v1009_v57 = vsel %vm173_vm1, %v2429_v34, %v809_v7 }
 0x1cf   :  { %v1026_v50 = vsel %vm1016_vm7, %v1009_v57, %v873_v21 }
 0x1d1   :  { %v967_v36 = vpop.permute.xlu2 %966 }
 0x1d2   :  { %v1041_v44 = vsel %vm1033_vm8, %v1024_v47, %v967_v36 }
 0x1d3   :  { %1751 = vmatmul.msk.f32.gmra.mxu1 %vm59_vm0, %v1041_v44 }
 0x1d5   :  { %v971_v27 = vpop.permute.xlu0 %970  ;;  %v881_v16 = vpop.permute.xlu1 %880 }
 0x1d6   :  { %v1043_v42 = vsel %vm1033_vm8, %v1026_v50, %v971_v27 }
 0x1d9   :  { %v815_v48 = vpop.permute.xlu2 %814 }
 0x1da   :  { %v1012_v39 = vsel %vm173_vm1, %v2521_v56, %v815_v48 }
 0x1db   :  { %1752 = vmatmul.msk.f32.gmra.mxu1 %vm59_vm0, %v1042_v59  ;;  %v1029_v49 = vsel %vm1016_vm7, %v1012_v39, %v879_v63 }
 0x1dd   :  { %v811_v35 = vpop.permute.xlu0 %810  ;;  %v875_v58 = vpop.permute.xlu1 %874 }
 0x1de   :  { %v1010_v34 = vsel %vm173_vm1, %v2453_v31, %v811_v35 }
 0x1df   :  { %v1027_v56 = vsel %vm1016_vm7, %v1010_v34, %v875_v58 }
 0x1e1   :  { %v977_v8 = vpop.permute.xlu2 %976 }
 0x1e2   :  { %v1046_v24 = vsel %vm1033_vm8, %v1029_v49, %v977_v8 }
 0x1e3   :  { %1753 = vmatmul.msk.f32.gmra.mxu1 %vm59_vm0, %v1043_v42  ;;  %1756 = vmatmul.msk.f32.vlgmr.msrb.gmra.mxu3 %vm59_vm0, %v1046_v24 }
 0x1e5   :  { %v973_v29 = vpop.permute.xlu0 %972  ;;  %v883_v41 = vpop.permute.xlu1 %882 }
 0x1e6   :  { %v1044_v55 = vsel %vm1033_vm8, %v1027_v56, %v973_v29 }
 0x1e9   :  { %v817_v13 = vpop.permute.xlu2 %816 }
 0x1ea   :  { %v1013_v60 = vsel %vm173_vm1, %v2477_v15, %v817_v13 }
 0x1eb   :  { %1754 = vmatmul.msk.f32.gmra.mxu1 %vm59_vm0, %v1044_v55  ;;  %v1030_v23 = vsel %vm1016_vm7, %v1013_v60, %v881_v16 }
 0x1ed   :  { %v813_v61 = vpop.permute.xlu0 %812  ;;  %v877_v10 = vpop.permute.xlu1 %876 }
 0x1ee   :  { %v1011_v37 = vsel %vm173_vm1, %v2491_v62, %v813_v61 }
 0x1ef   :  { %v1028_v31 = vsel %vm1016_vm7, %v1011_v37, %v877_v10 }
 0x1f1   :  { %v979_v1 = vpop.permute.xlu2 %978 }
 0x1f2   :  { %v1047_v33 = vsel %vm1033_vm8, %v1030_v23, %v979_v1 }
 0x1f3   :  { %1757 = vmatmul.msk.f32.gmra.mxu3 %vm59_vm0, %v1047_v33 }
 0x1f5   :  { %v975_v5 = vpop.permute.xlu0 %974  ;;  %v885_v12 = vpop.permute.xlu1 %884 }
 0x1f6   :  { %v1045_v32 = vsel %vm1033_vm8, %v1028_v31, %v975_v5 }
 0x1f7   :  { %1755 = vmatmul.msk.f32.gmra.mxu1 %vm59_vm0, %v1045_v32 }
 0x1f9   :  { %v819_v19 = vpop.permute.xlu2 %818 }
 0x1fa   :  { %v1014_v15 = vsel %vm173_vm1, %v2505_v51, %v819_v19 }
 0x1fb   :  { %v1031_v45 = vsel %vm1016_vm7, %v1014_v15, %v883_v41 }
 0x201   :  { %v981_v62 = vpop.permute.xlu2 %980 }
 0x202   :  { %v1048_v43 = vsel %vm1033_vm8, %v1031_v45, %v981_v62 }
 0x203   :  { %1758 = vmatmul.msk.f32.gmra.mxu3 %vm59_vm0, %v1048_v43 }
 0x209   :  { %v821_v9 = vpop.permute.xlu2 %820 }
 0x20a   :  { %v1015_v38 = vsel %vm173_vm1, %v2545_v4, %v821_v9 }
 0x20b   :  { %v1032_v25 = vsel %vm1016_vm7, %v1015_v38, %v885_v12 }
 0x20d   :  { %v2695_v51 = vpop.f32.mrf.mxu1 }
 0x20e   :  { %v1215_v63 = vmul.f32 %v2695_v51, %v2695_v51  ;;  %v1165_v30 = vsel %vm59_vm0, %v2695_v51, 0.0 }
 0x210   :  { %v1231_v47 = vsel %vm59_vm0, %v1215_v63, 0.0 }
 0x211   :  { %v983_v52 = vpop.permute.xlu2 %982 }
 0x212   :  { %v1049_v54 = vsel %vm1033_vm8, %v1032_v25, %v983_v52 }
 0x213   :  { %1759 = vmatmul.msk.f32.gmra.mxu3 %vm59_vm0, %v1049_v54 }
 0x215   :  { %v2697_v26 = vpop.f32.mrf.mxu1 }
 0x216   :  { %v1216_v3 = vmul.f32 %v2697_v26, %v2697_v26  ;;  %v1166_v46 = vsel %vm59_vm0, %v2697_v26, 0.0 }
 0x217   :  { %v1167_v22 = vadd.f32 %v1166_v46, %v1165_v30 }
 0x218   :  { %v1232_v18 = vsel %vm59_vm0, %v1216_v3, 0.0 }
 0x219   :  { %v1233_v16 = vadd.f32 %v1232_v18, %v1231_v47 }
 0x220   :  { %v2699_v2 = vpop.f32.mrf.mxu1 }
 0x221   :  { %v1217_v53 = vmul.f32 %v2699_v2, %v2699_v2  ;;  %v1168_v7 = vsel %vm59_vm0, %v2699_v2, 0.0 }
 0x222   :  { %v1169_v11 = vadd.f32 %v1168_v7, %v1167_v22 }
 0x223   :  { %v1234_v36 = vsel %vm59_vm0, %v1217_v53, 0.0 }
 0x224   :  { %v1235_v35 = vadd.f32 %v1234_v36, %v1233_v16 }
 0x22a   :  { %v2701_v6 = vpop.f32.mrf.mxu1 }
 0x22b   :  { %v1218_v21 = vmul.f32 %v2701_v6, %v2701_v6  ;;  %v1170_v44 = vsel %vm59_vm0, %v2701_v6, 0.0 }
 0x22c   :  { %v1171_v58 = vadd.f32 %v1170_v44, %v1169_v11 }
 0x22d   :  { %v1236_v20 = vsel %vm59_vm0, %v1218_v21, 0.0 }
 0x22e   :  { %v1237_v8 = vadd.f32 %v1236_v20, %v1235_v35 }
 0x238   :  { %v2703_v40 = vpop.f32.mrf.mxu1 }
 0x239   :  { %v1219_v27 = vmul.f32 %v2703_v40, %v2703_v40  ;;  %v1172_v48 = vsel %vm59_vm0, %v2703_v40, 0.0 }
 0x23a   :  { %v1173_v24 = vadd.f32 %v1172_v48, %v1171_v58 }
 0x23b   :  { %v1238_v39 = vsel %vm59_vm0, %v1219_v27, 0.0 }
 0x23c   :  { %v1239_v56 = vadd.f32 %v1238_v39, %v1237_v8 }
 0x240   :  { %v2705_v17 = vpop.f32.mrf.mxu1 }
 0x241   :  { %v1220_v59 = vmul.f32 %v2705_v17, %v2705_v17  ;;  %v1174_v50 = vsel %vm59_vm0, %v2705_v17, 0.0 }
 0x242   :  { %v1175_v13 = vadd.f32 %v1174_v50, %v1173_v24 }
 0x243   :  { %v1240_v29 = vsel %vm59_vm0, %v1220_v59, 0.0 }
 0x244   :  { %v1241_v37 = vadd.f32 %v1240_v29, %v1239_v56 }
 0x248   :  { %v2707_v4 = vpop.f32.mrf.mxu1 }
 0x249   :  { %v1221_v49 = vmul.f32 %v2707_v4, %v2707_v4  ;;  %v1176_v41 = vsel %vm59_vm0, %v2707_v4, 0.0 }
 0x24a   :  { %v1177_v10 = vadd.f32 %v1176_v41, %v1175_v13 }
 0x24b   :  { %v1242_v55 = vsel %vm59_vm0, %v1221_v49, 0.0 }
 0x24c   :  { %v1243_v33 = vadd.f32 %v1242_v55, %v1241_v37 }
 0x250   :  { %v2709_v14 = vpop.f32.mrf.mxu1 }
 0x251   :  { %v1222_v34 = vmul.f32 %v2709_v14, %v2709_v14  ;;  %v1178_v61 = vsel %vm59_vm0, %v2709_v14, 0.0 }
 0x252   :  { %v1179_v5 = vadd.f32 %v1178_v61, %v1177_v10 }
 0x253   :  { %v1244_v1 = vsel %vm59_vm0, %v1222_v34, 0.0 }
 0x254   :  { %v1245_v45 = vadd.f32 %v1244_v1, %v1243_v33 }
 0x258   :  { %v2711_v0 = vpop.f32.mrf.mxu1 }
 0x259   :  { %v1223_v60 = vmul.f32 %v2711_v0, %v2711_v0  ;;  %v1180_v23 = vsel %vm59_vm0, %v2711_v0, 0.0 }
 0x25a   :  { %v1181_v43 = vadd.f32 %v1180_v23, %v1179_v5 }
 0x25b   :  { %v1246_v19 = vsel %vm59_vm0, %v1223_v60, 0.0 }
 0x25c   :  { %v1247_v25 = vadd.f32 %v1246_v19, %v1245_v45 }
 0x260   :  { %v2713_v28 = vpop.f32.mrf.mxu1 }
 0x261   :  { %v1224_v31 = vmul.f32 %v2713_v28, %v2713_v28  ;;  %v1182_v15 = vsel %vm59_vm0, %v2713_v28, 0.0 }
 0x262   :  { %v1183_v54 = vadd.f32 %v1182_v15, %v1181_v43 }
 0x263   :  { %v1248_v38 = vsel %vm59_vm0, %v1224_v31, 0.0 }
 0x264   :  { %v1249_v46 = vadd.f32 %v1248_v38, %v1247_v25 }
 0x266   :  { %v2748_v42 = vpop.f32.mrf.mxu3 }
 0x267   :  { %v1227_v21 = vmul.f32 %v2748_v42, %v2748_v42  ;;  %v1188_v36 = vsel %vm59_vm0, %v2748_v42, 0.0 }
 0x268   :  { %v2741_v57 = vpop.f32.mrf.mxu1 }
 0x269   :  { %v1225_v62 = vmul.f32 %v2741_v57, %v2741_v57  ;;  %v1184_v12 = vsel %vm59_vm0, %v2741_v57, 0.0  ;;  %v1254_v27 = vsel %vm59_vm0, %v1227_v21, 0.0 }
 0x26a   :  { %v1185_v53 = vadd.f32 %v1184_v12, %v1183_v54 }
 0x26b   :  { %v1250_v3 = vsel %vm59_vm0, %v1225_v62, 0.0 }
 0x26c   :  { %v1251_v18 = vadd.f32 %v1250_v3, %v1249_v46 }
 0x274   :  { %v2765_v32 = vpop.f32.mrf.mxu1 }
 0x275   :  { %v1226_v52 = vmul.f32 %v2765_v32, %v2765_v32  ;;  %v1186_v63 = vsel %vm59_vm0, %v2765_v32, 0.0 }
 0x276   :  { %v2772_v9 = vpop.f32.mrf.mxu3  ;;  %v1187_v7 = vadd.f32 %v1186_v63, %v1185_v53 }
 0x277   :  { %v1252_v30 = vsel %vm59_vm0, %v1226_v52, 0.0  ;;  %v1228_v16 = vmul.f32 %v2772_v9, %v2772_v9  ;;  %v1190_v48 = vsel %vm59_vm0, %v2772_v9, 0.0 }
 0x278   :  { %v1253_v22 = vadd.f32 %v1252_v30, %v1251_v18  ;;  %v1189_v44 = vadd.f32 %v1188_v36, %v1187_v7 }
 0x279   :  { %v1256_v58 = vsel %vm59_vm0, %v1228_v16, 0.0 }
 0x27a   :  { %v1255_v20 = vadd.f32 %v1254_v27, %v1253_v22  ;;  %v1191_v35 = vadd.f32 %v1190_v48, %v1189_v44 }
 0x27c   :  { %v1257_v50 = vadd.f32 %v1256_v58, %v1255_v20  ;;  %v1281_v20 = vld [vmem:[%s3078_s7] sm:$0x1] }
 0x27d   :  { %v1282_v58 = vld [vmem:[%s3079_s8] sm:$0x1] }
 0x286   :  { %v2785_v47 = vpop.f32.mrf.mxu3 }
 0x287   :  { %v1229_v11 = vmul.f32 %v2785_v47, %v2785_v47  ;;  %v1192_v59 = vsel %vm59_vm0, %v2785_v47, 0.0 }
 0x288   :  { %v1193_v49 = vadd.f32 %v1192_v59, %v1191_v35 }
 0x289   :  { %v1258_v39 = vsel %vm59_vm0, %v1229_v11, 0.0 }
 0x28a   :  { %v1259_v41 = vadd.f32 %v1258_v39, %v1257_v50 }
 0x296   :  { %v2800_v8 = vpop.f32.mrf.mxu3 }
 0x297   :  { %v1194_v24 = vsel %vm59_vm0, %v2800_v8, 0.0  ;;  %v1230_v29 = vmul.f32 %v2800_v8, %v2800_v8 }
 0x298   :  { %v1195_v34 = vadd.f32 %v1194_v24, %v1193_v49  ;;  %v1379_v24 = vld [vmem:[%s3080_s9 + $0x8] sm:$0xff] }
 0x299   :  { %v1260_v56 = vsel %vm59_vm0, %v1230_v29, 0.0  ;;  %v1378_v29 = vld [vmem:[%s3080_s9] sm:$0xff]  ;;  %1442 = vmatpush.msra.mxu2 %v1379_v24  ;;  %1780 = vmatpush.msra.mxu3 %v1379_v24  ;;  %s1809_s9 = smov 112  }
 0x29a   :  { %v1196_v13 = vrot.slane %v1195_v34, 4  ;;  %v1261_v55 = vadd.f32 %v1260_v56, %v1259_v41 }
 0x29b   :  { %1443 = vmatpush.msra.mxu2 %v1378_v29  ;;  %1781 = vmatpush.msra.mxu3 %v1378_v29 }
 0x29c   :  { %v1197_v61 = vadd.f32 %v1196_v13, %v1195_v34  ;;  %v1262_v60 = vrot.slane %v1261_v55, 4 }
 0x29e   :  { %v1198_v37 = vrot.slane %v1197_v61, 2  ;;  %v1263_v10 = vadd.f32 %v1262_v60, %v1261_v55 }
 0x2a0   :  { %v1199_v1 = vadd.f32 %v1198_v37, %v1197_v61  ;;  %v1264_v23 = vrot.slane %v1263_v10, 2 }
 0x2a2   :  { %v1200_v31 = vrot.slane %v1199_v1, 1  ;;  %v1265_v33 = vadd.f32 %v1264_v23, %v1263_v10 }
 0x2a4   :  { %v1201_v5 = vadd.f32 %v1200_v31, %v1199_v1  ;;  %v1266_v19 = vrot.slane %v1265_v33, 1 }
 0x2a6   :  { %1207 = vrot.lane.b32.xlu1 %v1201_v5, %s1806_s6  ;;  %1203 = vrot.lane.b32.xlu0 %v1201_v5, %s1807_s13  ;;  %v1267_v15 = vadd.f32 %v1266_v19, %v1265_v33 }
 0x2a8   :  { %1269 = vrot.lane.b32.xlu2 %v1267_v15, %s1807_s13 }
 0x2ae   :  { %1273 = vrot.lane.b32.xlu1 %v1267_v15, %s1806_s6  ;;  %1211 = vrot.lane.b32.xlu0 %v1201_v5, %s1808_s14 }
 0x2b0   :  { %1277 = vrot.lane.b32.xlu2 %v1267_v15, %s1808_s14 }
 0x302   :  { %v1270_v62 = vpop.permute.xlu2 %1269 }
 0x303   :  { %v1272_v12 = vadd.f32 %v1270_v62, %v1267_v15 }
 0x30a   :  { %v1278_v46 = vpop.permute.xlu2 %1277 }
 0x318   :  { %v1208_v45 = vpop.permute.xlu1 %1207  ;;  %v1204_v43 = vpop.permute.xlu0 %1203 }
 0x319   :  { %v1206_v38 = vadd.f32 %v1204_v43, %v1201_v5 }
 0x31b   :  { %v1210_v52 = vadd.f32 %v1208_v45, %v1206_v38 }
 0x320   :  { %v1274_v25 = vpop.permute.xlu1 %1273  ;;  %v1212_v54 = vpop.permute.xlu0 %1211 }
 0x321   :  { %v1276_v3 = vadd.f32 %v1274_v25, %v1272_v12  ;;  %v1214_v63 = vadd.f32 %v1212_v54, %v1210_v52 }
 0x323   :  { %v1280_v53 = vadd.f32 %v1278_v46, %v1276_v3  ;;  %v1283_v30 = vmul.f32 0.001953125, %v1214_v63 }
 0x325   :  { %v1284_v18 = vmul.f32 0.001953125, %v1280_v53  ;;  %v1285_v7 = vmul.f32 %v1283_v30, %v1283_v30 }
 0x327   :  { %v1286_v21 = vsub.f32 %v1284_v18, %v1285_v7 }
 0x329   :  { %v1287_v22 = vadd.f32 1e-05, %v1286_v21 }
 0x32b   :  { %1798 = vrsqrt.f32 %v1287_v22  ;;  %vm1294_vm10 = vweird.f32 %v1287_v22 }
 0x331   :  { %v1799_v36 = vpop.eup %1798 }
 0x332   :  { %v1289_v44 = vmul.f32 %v1799_v36, %v1287_v22  ;;  %vm1295_vm9 = vweird.f32 %v1799_v36 }
 0x333   :  { %vm1296_vm11 = vmor %vm1294_vm10, %vm1295_vm9 }
 0x334   :  { %v1290_v27 = vmul.f32 %v1799_v36, %v1289_v44 }
 0x336   :  { %v1291_v16 = vmul.f32 0.5, %v1290_v27 }
 0x338   :  { %v1292_v11 = vsub.f32 1.5, %v1291_v16 }
 0x33a   :  { %v1293_v48 = vmul.f32 %v1799_v36, %v1292_v11 }
 0x33c   :  { %v1297_v59 = vsel %vm1296_vm11, %v1799_v36, %v1293_v48 }
 0x33d   :  { %v1298_v35 = vmul.f32 %v1297_v59, %v1281_v20 }
 0x33f   :  { %v1299_v39 = vmul.f32 %v1298_v35, %v1283_v30  ;;  %1308 = vrot.lane.b32.xlu2 %v1298_v35, %s1805_s27  ;;  %1305 = vrot.lane.b32.xlu1 %v1298_v35, %s1803_s4 }
 0x340   :  { %1302 = vrot.lane.b32.xlu0 %v1298_v35, %s1804_s5 }
 0x341   :  { %v1300_v50 = vsub.f32 %v1282_v58, %v1299_v39 }
 0x343   :  { %v1332_v49 = vperm.slane %v1300_v50, 0 }
 0x347   :  { %1339 = vrot.lane.b32.xlu2 %v1332_v49, %s1805_s27  ;;  %1336 = vrot.lane.b32.xlu1 %v1332_v49, %s1803_s4 }
 0x348   :  { %1333 = vrot.lane.b32.xlu0 %v1332_v49, %s1804_s5 }
 0x399   :  { %v1309_v34 = vpop.permute.xlu2 %1308 }
 0x3a1   :  { %v1340_v23 = vpop.permute.xlu2 %1339 }
 0x3b1   :  { %v1306_v41 = vpop.permute.xlu1 %1305 }
 0x3b2   :  { %v1303_v56 = vpop.permute.xlu0 %1302 }
 0x3b3   :  { %v1311_v13 = vsel %vm173_vm1, %v1298_v35, %v1303_v56 }
 0x3b4   :  { %v1312_v55 = vsel %vm1016_vm7, %v1311_v13, %v1306_v41 }
 0x3b5   :  { %v1313_v61 = vsel %vm1033_vm8, %v1312_v55, %v1309_v34 }
 0x3b6   :  { %v1314_v37 = vperm.slane %v1313_v61, 0 }
 0x3b8   :  { %v1315_v19 = vmul.f32 %v1314_v37, %v2695_v51  ;;  %v1327_v15 = vmul.f32 %v1314_v37, %v2748_v42  ;;  %v1323_v12 = vmul.f32 %v1314_v37, %v2711_v0  ;;  %v1324_v52 = vmul.f32 %v1314_v37, %v2713_v28 }
 0x3b9   :  { %v1337_v60 = vpop.permute.xlu1 %1336  ;;  %v1325_v25 = vmul.f32 %v1314_v37, %v2741_v57  ;;  %v1316_v54 = vmul.f32 %v1314_v37, %v2697_v26  ;;  %v1328_v51 = vmul.f32 %v1314_v37, %v2772_v9  ;;  %v1326_v42 = vmul.f32 %v1314_v37, %v2765_v32 }
 0x3ba   :  { %v1334_v10 = vpop.permute.xlu0 %1333  ;;  %v1317_v57 = vmul.f32 %v1314_v37, %v2699_v2  ;;  %v1329_v26 = vmul.f32 %v1314_v37, %v2785_v47  ;;  %v1318_v22 = vmul.f32 %v1314_v37, %v2701_v6  ;;  %v1330_v36 = vmul.f32 %v1314_v37, %v2800_v8 }
 0x3bb   :  { %v1342_v1 = vsel %vm173_vm1, %v1300_v50, %v1334_v10  ;;  %v1319_v2 = vmul.f32 %v1314_v37, %v2703_v40  ;;  %v1320_v48 = vmul.f32 %v1314_v37, %v2705_v17  ;;  %v1321_v8 = vmul.f32 %v1314_v37, %v2707_v4 }
 0x3bc   :  { %v1343_v31 = vsel %vm1016_vm7, %v1342_v1, %v1337_v60  ;;  %v1322_v39 = vmul.f32 %v1314_v37, %v2709_v14  ;;  %vm1642_vm1 = vcmask 195584  }
 0x3bd   :  { %v1344_v33 = vsel %vm1033_vm8, %v1343_v31, %v1340_v23 }
 0x3be   :  { %v1345_v5 = vperm.slane %v1344_v33, 0 }
 0x3c0   :  { %v1346_v62 = vadd.f32 %v1345_v5, %v1315_v19  ;;  %v1358_v45 = vadd.f32 %v1345_v5, %v1327_v15  ;;  %v1354_v3 = vadd.f32 %v1345_v5, %v1323_v12  ;;  %v1355_v63 = vadd.f32 %v1345_v5, %v1324_v52 }
 0x3c1   :  { %v1356_v46 = vadd.f32 %v1345_v5, %v1325_v25  ;;  %v1347_v53 = vadd.f32 %v1345_v5, %v1316_v54  ;;  %v1359_v30 = vadd.f32 %v1345_v5, %v1328_v51  ;;  %v1357_v0 = vadd.f32 %v1345_v5, %v1326_v42 }
 0x3c2   :  { %v1362_v43 = vmax.f32 %v1346_v62, 0.0  ;;  %v1374_v38 = vmax.f32 %v1358_v45, 0.0  ;;  %v1348_v7 = vadd.f32 %v1345_v5, %v1317_v57  ;;  %v1360_v9 = vadd.f32 %v1345_v5, %v1329_v26 }
 0x3c3   :  { %v1363_v18 = vmax.f32 %v1347_v53, 0.0  ;;  %v1375_v28 = vmax.f32 %v1359_v30, 0.0  ;;  %v1349_v44 = vadd.f32 %v1345_v5, %v1318_v22  ;;  %v1361_v27 = vadd.f32 %v1345_v5, %v1330_v36 }
 0x3c4   :  { %1760 = vmatmul.msk.f32.vlgmr.msra.gmra.mxu2 %vm59_vm0, %v1362_v43  ;;  %1772 = vmatmul.msk.f32.vlgmr.msra.gmra.mxu3 %vm59_vm0, %v1374_v38  ;;  %v1364_v21 = vmax.f32 %v1348_v7, 0.0  ;;  %v1376_v32 = vmax.f32 %v1360_v9, 0.0  ;;  %v1350_v47 = vadd.f32 %v1345_v5, %v1319_v2  ;;  %v1351_v59 = vadd.f32 %v1345_v5, %v1320_v48 }
 0x3c5   :  { %v1365_v16 = vmax.f32 %v1349_v44, 0.0  ;;  %v1377_v11 = vmax.f32 %v1361_v27, 0.0  ;;  %v1352_v35 = vadd.f32 %v1345_v5, %v1321_v8  ;;  %v1353_v50 = vadd.f32 %v1345_v5, %v1322_v39 }
 0x3c6   :  { %v1366_v20 = vmax.f32 %v1350_v47, 0.0  ;;  %v1367_v6 = vmax.f32 %v1351_v59, 0.0  ;;  %v1370_v49 = vmax.f32 %v1354_v3, 0.0  ;;  %v1371_v17 = vmax.f32 %v1355_v63, 0.0 }
 0x3c7   :  { %v1368_v58 = vmax.f32 %v1352_v35, 0.0  ;;  %v1369_v40 = vmax.f32 %v1353_v50, 0.0  ;;  %v1372_v24 = vmax.f32 %v1356_v46, 0.0  ;;  %v1373_v4 = vmax.f32 %v1357_v0, 0.0 }
 0x3cc   :  { %1761 = vmatmul.msk.f32.gmra.mxu2 %vm59_vm0, %v1363_v18  ;;  %1773 = vmatmul.msk.f32.gmra.mxu3 %vm59_vm0, %v1375_v28 }
 0x3d4   :  { %1762 = vmatmul.msk.f32.gmra.mxu2 %vm59_vm0, %v1364_v21  ;;  %1774 = vmatmul.msk.f32.gmra.mxu3 %vm59_vm0, %v1376_v32 }
 0x3dc   :  { %1763 = vmatmul.msk.f32.gmra.mxu2 %vm59_vm0, %v1365_v16  ;;  %1775 = vmatmul.msk.f32.gmra.mxu3 %vm59_vm0, %v1377_v11 }
 0x3e4   :  { %1764 = vmatmul.msk.f32.gmra.mxu2 %vm59_vm0, %v1366_v20 }
 0x3ec   :  { %1765 = vmatmul.msk.f32.gmra.mxu2 %vm59_vm0, %v1367_v6 }
 0x3f4   :  { %1766 = vmatmul.msk.f32.gmra.mxu2 %vm59_vm0, %v1368_v58 }
 0x3fc   :  { %1767 = vmatmul.msk.f32.gmra.mxu2 %vm59_vm0, %v1369_v40 }
 0x404   :  { %1768 = vmatmul.msk.f32.gmra.mxu2 %vm59_vm0, %v1370_v49 }
 0x40c   :  { %1769 = vmatmul.msk.f32.gmra.mxu2 %vm59_vm0, %v1371_v17 }
 0x414   :  { %1770 = vmatmul.msk.f32.gmra.mxu2 %vm59_vm0, %v1372_v24 }
 0x41c   :  { %1771 = vmatmul.msk.f32.gmra.mxu2 %vm59_vm0, %v1373_v4 }
 0x447   :  { %v2865_v29 = vpop.f32.mrf.mxu2  ;;  %v2881_v60 = vpop.f32.mrf.mxu3 }
 0x448   :  { %v1544_v1 = vmul.f32 %v2865_v29, %v2865_v29  ;;  %v1494_v33 = vsel %vm1493_vm12, %v2865_v29, 0.0 }
 0x44a   :  { %v1560_v45 = vsel %vm1493_vm12, %v1544_v1, 0.0 }
 0x44f   :  { %v2867_v41 = vpop.f32.mrf.mxu2  ;;  %v2906_v25 = vpop.f32.mrf.mxu3 }
 0x450   :  { %v1545_v10 = vmul.f32 %v2867_v41, %v2867_v41  ;;  %v1495_v23 = vsel %vm1493_vm12, %v2867_v41, 0.0 }
 0x451   :  { %v1496_v62 = vadd.f32 %v1495_v23, %v1494_v33 }
 0x452   :  { %v1561_v5 = vsel %vm1493_vm12, %v1545_v10, 0.0 }
 0x453   :  { %v1562_v52 = vadd.f32 %v1561_v5, %v1560_v45  ;;  %v1557_v45 = vmul.f32 %v2906_v25, %v2906_v25 }
 0x457   :  { %v2869_v14 = vpop.f32.mrf.mxu2  ;;  %v2937_v48 = vpop.f32.mrf.mxu3 }
 0x458   :  { %v1546_v31 = vmul.f32 %v2869_v14, %v2869_v14  ;;  %v1497_v19 = vsel %vm1493_vm12, %v2869_v14, 0.0 }
 0x459   :  { %v1498_v54 = vadd.f32 %v1497_v19, %v1496_v62  ;;  %v1517_v62 = vsel %vm1493_vm12, %v2881_v60, 0.0 }
 0x45a   :  { %v1563_v43 = vsel %vm1493_vm12, %v1546_v31, 0.0  ;;  %v1556_v31 = vmul.f32 %v2881_v60, %v2881_v60 }
 0x45b   :  { %v1564_v46 = vadd.f32 %v1563_v43, %v1562_v52 }
 0x45f   :  { %v2871_v34 = vpop.f32.mrf.mxu2 }
 0x460   :  { %v1547_v15 = vmul.f32 %v2871_v34, %v2871_v34  ;;  %v1499_v38 = vsel %vm1493_vm12, %v2871_v34, 0.0 }
 0x461   :  { %v1500_v53 = vadd.f32 %v1499_v38, %v1498_v54  ;;  %v2961_v38 = vpop.f32.mrf.mxu3  ;;  %v1583_v54 = vsel %vm1493_vm12, %v1556_v31, 0.0 }
 0x462   :  { %v1565_v42 = vsel %vm1493_vm12, %v1547_v15, 0.0 }
 0x463   :  { %v1566_v28 = vadd.f32 %v1565_v42, %v1564_v46  ;;  %v1519_v42 = vsel %vm1493_vm12, %v2906_v25, 0.0 }
 0x467   :  { %v2873_v56 = vpop.f32.mrf.mxu2 }
 0x468   :  { %v1548_v12 = vmul.f32 %v2873_v56, %v2873_v56  ;;  %v1501_v3 = vsel %vm1493_vm12, %v2873_v56, 0.0 }
 0x469   :  { %v1502_v57 = vadd.f32 %v1501_v3, %v1500_v53  ;;  %v1558_v3 = vmul.f32 %v2937_v48, %v2937_v48  ;;  %v1585_v53 = vsel %vm1493_vm12, %v1557_v45, 0.0 }
 0x46a   :  { %v1567_v30 = vsel %vm1493_vm12, %v1548_v12, 0.0 }
 0x46b   :  { %v1568_v21 = vadd.f32 %v1567_v30, %v1566_v28  ;;  %v1521_v30 = vsel %vm1493_vm12, %v2937_v48, 0.0 }
 0x46f   :  { %v2875_v13 = vpop.f32.mrf.mxu2 }
 0x470   :  { %v1549_v63 = vmul.f32 %v2875_v13, %v2875_v13  ;;  %v1503_v0 = vsel %vm1493_vm12, %v2875_v13, 0.0 }
 0x471   :  { %v1504_v32 = vadd.f32 %v1503_v0, %v1502_v57  ;;  %v1559_v0 = vmul.f32 %v2961_v38, %v2961_v38  ;;  %v1587_v57 = vsel %vm1493_vm12, %v1558_v3, 0.0  ;;  %v1610_v3 = vld [vmem:[%s3081_s10] sm:$0x1] }
 0x472   :  { %v1569_v26 = vsel %vm1493_vm12, %v1549_v63, 0.0 }
 0x473   :  { %v1570_v27 = vadd.f32 %v1569_v26, %v1568_v21  ;;  %v1523_v26 = vsel %vm1493_vm12, %v2961_v38, 0.0  ;;  %v1589_v21 = vsel %vm1493_vm12, %v1559_v0, 0.0 }
 0x477   :  { %v2877_v55 = vpop.f32.mrf.mxu2 }
 0x478   :  { %v1550_v18 = vmul.f32 %v2877_v55, %v2877_v55  ;;  %v1505_v7 = vsel %vm1493_vm12, %v2877_v55, 0.0 }
 0x479   :  { %v1506_v16 = vadd.f32 %v1505_v7, %v1504_v32 }
 0x47a   :  { %v1571_v22 = vsel %vm1493_vm12, %v1550_v18, 0.0 }
 0x47b   :  { %v1572_v59 = vadd.f32 %v1571_v22, %v1570_v27 }
 0x47f   :  { %v2879_v61 = vpop.f32.mrf.mxu2 }
 0x480   :  { %v1551_v9 = vmul.f32 %v2879_v61, %v2879_v61  ;;  %v1507_v36 = vsel %vm1493_vm12, %v2879_v61, 0.0 }
 0x481   :  { %v1508_v6 = vadd.f32 %v1507_v36, %v1506_v16 }
 0x482   :  { %v1573_v2 = vsel %vm1493_vm12, %v1551_v9, 0.0 }
 0x483   :  { %v1574_v39 = vadd.f32 %v1573_v2, %v1572_v59 }
 0x487   :  { %v2883_v37 = vpop.f32.mrf.mxu2 }
 0x488   :  { %v1552_v44 = vmul.f32 %v2883_v37, %v2883_v37  ;;  %v1509_v47 = vsel %vm1493_vm12, %v2883_v37, 0.0 }
 0x489   :  { %v1510_v50 = vadd.f32 %v1509_v47, %v1508_v6 }
 0x48a   :  { %v1575_v8 = vsel %vm1493_vm12, %v1552_v44, 0.0 }
 0x48b   :  { %v1576_v17 = vadd.f32 %v1575_v8, %v1574_v39 }
 0x48f   :  { %v2908_v51 = vpop.f32.mrf.mxu2 }
 0x490   :  { %v1553_v20 = vmul.f32 %v2908_v51, %v2908_v51  ;;  %v1511_v35 = vsel %vm1493_vm12, %v2908_v51, 0.0 }
 0x491   :  { %v1512_v24 = vadd.f32 %v1511_v35, %v1510_v50 }
 0x492   :  { %v1577_v40 = vsel %vm1493_vm12, %v1553_v20, 0.0 }
 0x493   :  { %v1578_v10 = vadd.f32 %v1577_v40, %v1576_v17 }
 0x497   :  { %v2930_v11 = vpop.f32.mrf.mxu2 }
 0x498   :  { %v1554_v58 = vmul.f32 %v2930_v11, %v2930_v11  ;;  %v1513_v49 = vsel %vm1493_vm12, %v2930_v11, 0.0 }
 0x499   :  { %v1514_v1 = vadd.f32 %v1513_v49, %v1512_v24 }
 0x49a   :  { %v1579_v4 = vsel %vm1493_vm12, %v1554_v58, 0.0 }
 0x49b   :  { %v1580_v19 = vadd.f32 %v1579_v4, %v1578_v10 }
 0x49f   :  { %v2948_v23 = vpop.f32.mrf.mxu2 }
 0x4a0   :  { %v1515_v33 = vsel %vm1493_vm12, %v2948_v23, 0.0  ;;  %v1555_v5 = vmul.f32 %v2948_v23, %v2948_v23 }
 0x4a1   :  { %v1516_v15 = vadd.f32 %v1515_v33, %v1514_v1 }
 0x4a2   :  { %v1581_v43 = vsel %vm1493_vm12, %v1555_v5, 0.0 }
 0x4a3   :  { %v1518_v12 = vadd.f32 %v1517_v62, %v1516_v15  ;;  %v1582_v52 = vadd.f32 %v1581_v43, %v1580_v19 }
 0x4a5   :  { %v1520_v63 = vadd.f32 %v1519_v42, %v1518_v12  ;;  %v1584_v46 = vadd.f32 %v1583_v54, %v1582_v52 }
 0x4a7   :  { %v1522_v18 = vadd.f32 %v1521_v30, %v1520_v63  ;;  %v1586_v28 = vadd.f32 %v1585_v53, %v1584_v46  ;;  %v1611_v30 = vld [vmem:[%s3082_s11] sm:$0x1] }
 0x4a9   :  { %v1524_v7 = vadd.f32 %v1523_v26, %v1522_v18  ;;  %v1588_v9 = vadd.f32 %v1587_v57, %v1586_v28 }
 0x4ab   :  { %v1525_v32 = vrot.slane %v1524_v7, 4  ;;  %v1590_v22 = vadd.f32 %v1589_v21, %v1588_v9 }
 0x4ad   :  { %v1526_v36 = vadd.f32 %v1525_v32, %v1524_v7  ;;  %v1591_v44 = vrot.slane %v1590_v22, 4 }
 0x4af   :  { %v1527_v27 = vrot.slane %v1526_v36, 2  ;;  %v1592_v16 = vadd.f32 %v1591_v44, %v1590_v22 }
 0x4b1   :  { %v1528_v2 = vadd.f32 %v1527_v27, %v1526_v36  ;;  %v1593_v47 = vrot.slane %v1592_v16, 2 }
 0x4b3   :  { %v1529_v20 = vrot.slane %v1528_v2, 1  ;;  %v1594_v59 = vadd.f32 %v1593_v47, %v1592_v16 }
 0x4b5   :  { %v1530_v6 = vadd.f32 %v1529_v20, %v1528_v2  ;;  %v1595_v8 = vrot.slane %v1594_v59, 1 }
 0x4b7   :  { %1536 = vrot.lane.b32.xlu1 %v1530_v6, %s1809_s9  ;;  %1532 = vrot.lane.b32.xlu0 %v1530_v6, %s1806_s6  ;;  %v1596_v35 = vadd.f32 %v1595_v8, %v1594_v59 }
 0x4b9   :  { %1598 = vrot.lane.b32.xlu2 %v1596_v35, %s1806_s6 }
 0x4bf   :  { %1602 = vrot.lane.b32.xlu1 %v1596_v35, %s1809_s9  ;;  %1540 = vrot.lane.b32.xlu0 %v1530_v6, %s1810_s20 }
 0x4c1   :  { %1606 = vrot.lane.b32.xlu2 %v1596_v35, %s1810_s20 }
 0x513   :  { %v1599_v58 = vpop.permute.xlu2 %1598 }
 0x514   :  { %v1601_v49 = vadd.f32 %v1599_v58, %v1596_v35 }
 0x51b   :  { %v1607_v31 = vpop.permute.xlu2 %1606 }
 0x529   :  { %v1537_v39 = vpop.permute.xlu1 %1536  ;;  %v1533_v50 = vpop.permute.xlu0 %1532 }
 0x52a   :  { %v1535_v40 = vadd.f32 %v1533_v50, %v1530_v6 }
 0x52c   :  { %v1539_v17 = vadd.f32 %v1537_v39, %v1535_v40 }
 0x531   :  { %v1603_v24 = vpop.permute.xlu1 %1602  ;;  %v1541_v4 = vpop.permute.xlu0 %1540 }
 0x532   :  { %v1605_v10 = vadd.f32 %v1603_v24, %v1601_v49  ;;  %v1543_v1 = vadd.f32 %v1541_v4, %v1539_v17 }
 0x534   :  { %v1609_v33 = vadd.f32 %v1607_v31, %v1605_v10  ;;  %v1612_v5 = vmul.f32 0.001953125, %v1543_v1 }
 0x536   :  { %v1613_v19 = vmul.f32 0.001953125, %v1609_v33  ;;  %v1614_v15 = vmul.f32 %v1612_v5, %v1612_v5 }
 0x538   :  { %v1615_v62 = vsub.f32 %v1613_v19, %v1614_v15 }
 0x53a   :  { %v1616_v45 = vadd.f32 1e-05, %v1615_v62 }
 0x53c   :  { %1800 = vrsqrt.f32 %v1616_v45  ;;  %vm1623_vm14 = vweird.f32 %v1616_v45 }
 0x542   :  { %v1801_v43 = vpop.eup %1800 }
 0x543   :  { %v1618_v12 = vmul.f32 %v1801_v43, %v1616_v45  ;;  %vm1624_vm13 = vweird.f32 %v1801_v43 }
 0x544   :  { %vm1625_vm15 = vmor %vm1623_vm14, %vm1624_vm13 }
 0x545   :  { %v1619_v52 = vmul.f32 %v1801_v43, %v1618_v12 }
 0x547   :  { %v1620_v54 = vmul.f32 0.5, %v1619_v52 }
 0x549   :  { %v1621_v42 = vsub.f32 1.5, %v1620_v54 }
 0x54b   :  { %v1622_v63 = vmul.f32 %v1801_v43, %v1621_v42 }
 0x54d   :  { %v1626_v46 = vsel %vm1625_vm15, %v1801_v43, %v1622_v63 }
 0x54e   :  { %v1627_v53 = vmul.f32 %v1626_v46, %v1610_v3 }
 0x550   :  { %v1628_v0 = vmul.f32 %v1627_v53, %v1612_v5  ;;  %1637 = vrot.lane.b32.xlu2 %v1627_v53, %s1811_s1  ;;  %1634 = vrot.lane.b32.xlu1 %v1627_v53, %s1812_s2 }
 0x551   :  { %1631 = vrot.lane.b32.xlu0 %v1627_v53, %s1803_s4 }
 0x552   :  { %v1629_v18 = vsub.f32 %v1611_v30, %v1628_v0 }
 0x554   :  { %v1662_v28 = vperm.slane %v1629_v18, 0 }
 0x558   :  { %1669 = vrot.lane.b32.xlu2 %v1662_v28, %s1811_s1  ;;  %1666 = vrot.lane.b32.xlu1 %v1662_v28, %s1812_s2 }
 0x559   :  { %1663 = vrot.lane.b32.xlu0 %v1662_v28, %s1803_s4 }
 0x5aa   :  { %v1638_v7 = vpop.permute.xlu2 %1637 }
 0x5b2   :  { %v1670_v16 = vpop.permute.xlu2 %1669 }
 0x5c2   :  { %v1635_v57 = vpop.permute.xlu1 %1634 }
 0x5c3   :  { %v1632_v26 = vpop.permute.xlu0 %1631 }
 0x5c4   :  { %v1640_v9 = vsel %vm1016_vm7, %v1627_v53, %v1632_v26 }
 0x5c5   :  { %v1641_v21 = vsel %vm59_vm0, %v1640_v9, %v1635_v57 }
 0x5c6   :  { %v1643_v32 = vsel %vm1642_vm1, %v1641_v21, %v1638_v7 }
 0x5c7   :  { %v1644_v44 = vperm.slane %v1643_v32, 0 }
 0x5c9   :  { %v1645_v20 = vmul.f32 %v1644_v44, %v2865_v29  ;;  %v1646_v59 = vmul.f32 %v1644_v44, %v2867_v41  ;;  %v1647_v6 = vmul.f32 %v1644_v44, %v2869_v14  ;;  %v1648_v35 = vmul.f32 %v1644_v44, %v2871_v34 }
 0x5ca   :  { %v1667_v22 = vpop.permute.xlu1 %1666  ;;  %v1649_v58 = vmul.f32 %v1644_v44, %v2873_v56  ;;  %v1650_v49 = vmul.f32 %v1644_v44, %v2875_v13  ;;  %v1651_v24 = vmul.f32 %v1644_v44, %v2877_v55  ;;  %v1652_v29 = vmul.f32 %v1644_v44, %v2879_v61 }
 0x5cb   :  { %v1664_v36 = vpop.permute.xlu0 %1663  ;;  %v1653_v41 = vmul.f32 %v1644_v44, %v2883_v37  ;;  %v1654_v56 = vmul.f32 %v1644_v44, %v2908_v51  ;;  %v1655_v19 = vmul.f32 %v1644_v44, %v2930_v11  ;;  %v1656_v55 = vmul.f32 %v1644_v44, %v2948_v23 }
 0x5cc   :  { %v1672_v27 = vsel %vm1016_vm7, %v1629_v18, %v1664_v36  ;;  %v1657_v51 = vmul.f32 %v1644_v44, %v2881_v60  ;;  %v1658_v45 = vmul.f32 %v1644_v44, %v2906_v25  ;;  %v1659_v12 = vmul.f32 %v1644_v44, %v2937_v48 }
 0x5cd   :  { %v1673_v2 = vsel %vm59_vm0, %v1672_v27, %v1667_v22  ;;  %v1660_v54 = vmul.f32 %v1644_v44, %v2961_v38 }
 0x5ce   :  { %v1674_v47 = vsel %vm1642_vm1, %v1673_v2, %v1670_v16 }
 0x5cf   :  { %v1675_v8 = vperm.slane %v1674_v47, 0 }
 0x5d1   :  { %v1676_v39 = vadd.f32 %v1675_v8, %v1645_v20  ;;  %v1677_v50 = vadd.f32 %v1675_v8, %v1646_v59  ;;  %v1678_v40 = vadd.f32 %v1675_v8, %v1647_v6  ;;  %v1679_v17 = vadd.f32 %v1675_v8, %v1648_v35 }
 0x5d2   :  { %v1680_v4 = vadd.f32 %v1675_v8, %v1649_v58  ;;  %v1681_v10 = vadd.f32 %v1675_v8, %v1650_v49  ;;  %v1682_v14 = vadd.f32 %v1675_v8, %v1651_v24  ;;  %v1683_v33 = vadd.f32 %v1675_v8, %v1652_v29 }
 0x5d3   :  { %v1692_v1 = vmax.f32 %v1676_v39, 0.0  ;;  %v1693_v31 = vmax.f32 %v1677_v50, 0.0  ;;  %v1694_v34 = vmax.f32 %v1678_v40, 0.0  ;;  %v1695_v5 = vmax.f32 %v1679_v17, 0.0 }
 0x5d4   :  { %v1684_v13 = vadd.f32 %v1675_v8, %v1653_v41  ;;  %v1696_v15 = vmax.f32 %v1680_v4, 0.0  ;;  %v1685_v61 = vadd.f32 %v1675_v8, %v1654_v56  ;;  %v1697_v37 = vmax.f32 %v1681_v10, 0.0 }
 0x5d5   :  { %1708 = vst.msk [vmem:[%s3083_s12] sm:$0xff] %vm1493_vm12, %v1692_v1  ;;  %v1686_v62 = vadd.f32 %v1675_v8, %v1655_v19  ;;  %v1698_v11 = vmax.f32 %v1682_v14, 0.0  ;;  %v1687_v43 = vadd.f32 %v1675_v8, %v1656_v55  ;;  %v1699_v23 = vmax.f32 %v1683_v33, 0.0 }
 0x5d6   :  { %1709 = vst.msk [vmem:[%s3083_s12 + $0x8] sm:$0xff] %vm1493_vm12, %v1693_v31  ;;  %v1688_v52 = vadd.f32 %v1675_v8, %v1657_v51  ;;  %v1700_v60 = vmax.f32 %v1684_v13, 0.0  ;;  %v1689_v42 = vadd.f32 %v1675_v8, %v1658_v45  ;;  %v1701_v25 = vmax.f32 %v1685_v61, 0.0 }
 0x5d7   :  { %1710 = vst.msk [vmem:[%s3083_s12 + $0x10] sm:$0xff] %vm1493_vm12, %v1694_v34  ;;  %v1690_v3 = vadd.f32 %v1675_v8, %v1659_v12  ;;  %v1702_v63 = vmax.f32 %v1686_v62, 0.0  ;;  %v1691_v48 = vadd.f32 %v1675_v8, %v1660_v54  ;;  %v1703_v46 = vmax.f32 %v1687_v43, 0.0 }
 0x5d8   :  { %1711 = vst.msk [vmem:[%s3083_s12 + $0x18] sm:$0xff] %vm1493_vm12, %v1695_v5  ;;  %v1704_v38 = vmax.f32 %v1688_v52, 0.0  ;;  %v1705_v53 = vmax.f32 %v1689_v42, 0.0 }
 0x5d9   :  { %1712 = vst.msk [vmem:[%s3083_s12 + $0x20] sm:$0xff] %vm1493_vm12, %v1696_v15  ;;  %v1706_v30 = vmax.f32 %v1690_v3, 0.0  ;;  %v1707_v0 = vmax.f32 %v1691_v48, 0.0 }
 0x5da   :  { %1713 = vst.msk [vmem:[%s3083_s12 + $0x28] sm:$0xff] %vm1493_vm12, %v1697_v37 }
 0x5db   :  { %1714 = vst.msk [vmem:[%s3083_s12 + $0x30] sm:$0xff] %vm1493_vm12, %v1698_v11 }
 0x5dc   :  { %1715 = vst.msk [vmem:[%s3083_s12 + $0x38] sm:$0xff] %vm1493_vm12, %v1699_v23 }
 0x5dd   :  { %1716 = vst.msk [vmem:[%s3083_s12 + $0x40] sm:$0xff] %vm1493_vm12, %v1700_v60 }
 0x5de   :  { %1717 = vst.msk [vmem:[%s3083_s12 + $0x48] sm:$0xff] %vm1493_vm12, %v1701_v25 }
 0x5df   :  { %1718 = vst.msk [vmem:[%s3083_s12 + $0x50] sm:$0xff] %vm1493_vm12, %v1702_v63 }
 0x5e0   :  { %1719 = vst.msk [vmem:[%s3083_s12 + $0x58] sm:$0xff] %vm1493_vm12, %v1703_v46 }
 0x5e1   :  { %1720 = vst.msk [vmem:[%s3083_s12 + $0x60] sm:$0xff] %vm1493_vm12, %v1704_v38 }
 0x5e2   :  { %1721 = vst.msk [vmem:[%s3083_s12 + $0x68] sm:$0xff] %vm1493_vm12, %v1705_v53 }
 0x5e3   :  { %1722 = vst.msk [vmem:[%s3083_s12 + $0x70] sm:$0xff] %vm1493_vm12, %v1706_v30 }
 0x5e4   :  { %1723 = vst.msk [vmem:[%s3083_s12 + $0x78] sm:$0xff] %vm1493_vm12, %v1707_v0 }

</bundles_post_ra>
